<compile_context>
chip_gen: v5e
topology: v5e:2x2
jax: 0.10.0
libtpu: 0.0.40
codegen_flags: <defaults>
</compile_context>

<pallas_src>
import functools

import jax
import jax.numpy as jnp
from jax.experimental import pallas as pl
from jax.experimental.pallas import tpu as pltpu


# ----------------------------------------------------------------------------- kernel
def _stft_loss_kernel(f_ref, b_ref, out_ref, *, eps, n_bins, m_valid):
    """One frame tile: f_ref holds [x frames ; y frames] stacked along rows."""
    tm = f_ref.shape[0] // 2
    lhs = f_ref[...]                                    # (2*tm, N) bf16
    rhs = b_ref[...]                                    # (N, 2K) bf16 = [w*cos | w*sin]

    # Single MXU matmul covering both signals of the tile; f32 accumulation.
    z = jnp.dot(lhs, rhs, preferred_element_type=jnp.float32)      # (2*tm, 2K)

    rx, ix = z[:tm, :n_bins], z[:tm, n_bins:]
    ry, iy = z[tm:, :n_bins], z[tm:, n_bins:]

    mag_x = jnp.sqrt(jnp.maximum(rx * rx + ix * ix, eps))
    mag_y = jnp.sqrt(jnp.maximum(ry * ry + iy * iy, eps))
    # STFT is linear: STFT(x + y) = STFT(x) + STFT(y).
    rs, ims = rx + ry, ix + iy
    mag_xy = jnp.sqrt(jnp.maximum(rs * rs + ims * ims, eps))

    d = (mag_x + mag_y) - mag_xy                        # (tm, K)

    # Mask zero/clamped padded tail frame rows out of the reduction.
    rows = (pl.program_id(0) * tm
            + jax.lax.broadcasted_iota(jnp.int32, (tm, 1), 0))     # (tm, 1)
    dd = jnp.where(rows < m_valid, d * d, 0.0)

    # Lane-dense per-block partial: reduce over rows only; blocks + lanes finish in JAX.
    out_ref[...] = jnp.sum(dd, axis=0, keepdims=True).reshape(1, 1, n_bins)


# --------------------------------------------------------------------------- helpers
def _hann_window(n):
    # torch.hann_window default (periodic=True)
    i = jnp.arange(n, dtype=jnp.float32)
    return 0.5 * (1.0 - jnp.cos(2.0 * jnp.pi * i / n))


def _windowed_dft_basis(fft_size, n_bins, window):
    """(N, 2K) bf16 basis = window[:, None] * [cos | sin] (imag sign irrelevant under |.|)."""
    n = jnp.arange(fft_size, dtype=jnp.float32)[:, None]            # (N, 1)
    k = jnp.arange(n_bins, dtype=jnp.float32)[None, :]              # (1, K)
    ang = 2.0 * jnp.pi * n * k / fft_size
    basis = jnp.concatenate([jnp.cos(ang), jnp.sin(ang)], axis=1)   # (N, 2K)
    return (window[:, None] * basis).astype(jnp.bfloat16)


def _round_up(v, mult):
    return ((v + mult - 1) // mult) * mult


# --------------------------------------------------------------------- jitted forward
@functools.partial(
    jax.jit, static_argnames=("fft_size", "hop_size", "n_bins", "eps", "row_tile"))
def _stft_loss_fwd(x, y, basis, *, fft_size, hop_size, n_bins, eps, row_tile):
    t = x.shape[-1]
    x2d = x.reshape(-1, t)
    y2d = y.reshape(-1, t)
    n_sig = x2d.shape[0]

    # Cast to bf16 BEFORE framing (perf review item 1): the overlapped-frame gather
    # below then writes 2 B/elem once, instead of f32 frames + a second pad/cast pass.
    sig = jnp.stack([x2d, y2d]).astype(jnp.bfloat16)                 # (2, S, T)
    pad = fft_size // 2
    sigp = jnp.pad(sig, ((0, 0), (0, 0), (pad, pad)), mode="reflect")  # (2, S, T+N)

    n_frames = 1 + t // hop_size            # torch.stft center=True frame count
    m = n_sig * n_frames                    # valid frame rows
    tm = min(row_tile, _round_up(m, 8))     # frame rows per block (multiple of 8)
    n_blocks = pl.cdiv(m, tm)

    # Frame gather with row padding folded in (no separate jnp.pad over frames) and a
    # block-major [x-tile ; y-tile] layout so the kernel does ONE matmul per block.
    r = jnp.arange(n_blocks * 2 * tm)
    blk, within = r // (2 * tm), r % (2 * tm)
    sig_sel = within // tm                                   # 0 -> x rows, 1 -> y rows
    gframe = jnp.minimum(blk * tm + within % tm, m - 1)      # clamp tail (masked later)
    s_id = gframe // n_frames
    f_id = gframe % n_frames
    col = f_id[:, None] * hop_size + jnp.arange(fft_size)[None, :]
    frames = sigp[sig_sel[:, None], s_id[:, None], col]      # (n_blocks*2*tm, N) bf16
    # TODO(synk): do this framing inside the kernel (hop-chunk matmul or manual DMA)
    # to avoid materializing the (fft/hop)x-overlapped frames array in HBM at all.

    kernel = functools.partial(_stft_loss_kernel, eps=eps, n_bins=n_bins, m_valid=m)
    partials = pl.pallas_call(
        kernel,
        out_shape=jax.ShapeDtypeStruct((n_blocks, 1, n_bins), jnp.float32),
        grid=(n_blocks,),
        in_specs=[
            pl.BlockSpec((2 * tm, fft_size), lambda i: (i, 0)),      # [x;y] frame tile
            pl.BlockSpec((fft_size, 2 * n_bins), lambda i: (0, 0)),  # basis (revisited)
        ],
        out_specs=pl.BlockSpec((1, 1, n_bins), lambda i: (i, 0, 0)),
        compiler_params=pltpu.CompilerParams(
            dimension_semantics=("parallel",),   # 2-TC sharding on v7x, no-op elsewhere
            vmem_limit_bytes=32 * 1024 * 1024,
        ),
    )(frames, basis)

    return jnp.sum(partials) / (m * n_bins)                  # MSE 'mean'


# ------------------------------------------------------------------------------ module
class STFTLossPallas:
    """Pallas/TPU port of the PyTorch STFTLoss module (forward pass)."""

    def __init__(self, fft_size=1024, hop_size=256, win_length=1024,
                 window="hann_window", eps=1e-8, row_tile=512):
        assert window == "hann_window"
        assert win_length == fft_size, "module is used with win_length == fft_size"
        self.fft_size = fft_size
        self.hop_size = hop_size
        self.eps = float(eps)
        self.n_bins = fft_size // 8          # spec keeps only the first fft_size//8 bins
        self.row_tile = int(row_tile)
        self.basis = _windowed_dft_basis(
            fft_size, self.n_bins, _hann_window(win_length))          # (N, 2K) bf16

    def __call__(self, x, y):
        return _stft_loss_fwd(x, y, self.basis,
                              fft_size=self.fft_size, hop_size=self.hop_size,
                              n_bins=self.n_bins, eps=self.eps,
                              row_tile=self.row_tile)


# --------------------------------------------------------------------------- reference
def _reference_loss(x, y, fft_size, hop_size, eps):
    """Independent f32 JAX reference using rfft (torch.stft center=True semantics)."""
    win = _hann_window(fft_size)

    def stft_mag(sig2d):
        pad = fft_size // 2
        sp = jnp.pad(sig2d, ((0, 0), (pad, pad)), mode="reflect")
        n_frames = 1 + sig2d.shape[-1] // hop_size
        idx = (jnp.arange(n_frames)[:, None] * hop_size
               + jnp.arange(fft_size)[None, :])
        frames = sp[:, idx] * win[None, None, :]
        spec = jnp.fft.rfft(frames, axis=-1)[..., : fft_size // 8]
        return jnp.sqrt(jnp.maximum(jnp.abs(spec) ** 2, eps))

    x2 = x.reshape(-1, x.shape[-1]).astype(jnp.float32)
    y2 = y.reshape(-1, y.shape[-1]).astype(jnp.float32)
    mx, my, mxy = stft_mag(x2), stft_mag(y2), stft_mag(x2 + y2)
    return jnp.mean(((mx + my) - mxy) ** 2)


if __name__ == "__main__":
    # Module defaults (fft=1024 keeps all lane boundaries 128-aligned: n_bins = 128).
    fft_size, hop_size = 1024, 256
    # Small row_tile here only to exercise multi-block grid + tail-row masking at this
    # tiny test size; production default is 512.
    loss_mod = STFTLossPallas(fft_size=fft_size, hop_size=hop_size,
                              win_length=fft_size, eps=1e-8, row_tile=32)

    key = jax.random.PRNGKey(0)
    kx, ky = jax.random.split(key)
    # x.view(-1, x.size(-1)) -> (2*4, 2048) signals; T > fft//2 for reflect padding.
    x = jax.random.normal(kx, (2, 4, 2048), dtype=jnp.float32)
    y = jax.random.normal(ky, (2, 4, 2048), dtype=jnp.float32)

    loss = jax.block_until_ready(loss_mod(x, y))
    ref = jax.block_until_ready(_reference_loss(x, y, fft_size, hop_size, 1e-8))

    rel_err = abs(float(loss) - float(ref)) / max(abs(float(ref)), 1e-6)
    assert rel_err < 5e-2, f"mismatch: pallas={float(loss)} ref={float(ref)} rel={rel_err}"
    print("KERNEL_OK")
</pallas_src>

<mosaic_0001>
module attributes {stable_mosaic.version = 11 : i64} {
  func.func @_stft_loss_kernel(%arg0: i32, %arg1: memref<64x1024xbf16, #tpu.memory_space<vmem>>, %arg2: memref<1024x256xbf16, #tpu.memory_space<vmem>>, %arg3: memref<1x1x128xf32, #tpu.memory_space<vmem>>) attributes {dimension_semantics = [#tpu.dimension_semantics<parallel>], iteration_bounds = array<i64: 3>, scalar_prefetch = 0 : i64, scratch_operands = 0 : i64, tpu.core_type = #tpu.core_type<tc>, window_params = [{transform_indices = @transform_0, window_bounds = array<i64: 64, 1024>}, {pipeline_mode = #tpu.pipeline_mode<synchronous>, transform_indices = @transform_1, window_bounds = array<i64: 1024, 256>}, {transform_indices = @transform_2, window_bounds = array<i64: 1, 1, 128>}]} {
    %c0 = arith.constant 0 : index
    %c0_0 = arith.constant 0 : index
    %0 = vector.load %arg1[%c0, %c0_0] : memref<64x1024xbf16, #tpu.memory_space<vmem>>, vector<64x1024xbf16>
    %c0_1 = arith.constant 0 : index
    %c0_2 = arith.constant 0 : index
    %1 = vector.load %arg2[%c0_1, %c0_2] : memref<1024x256xbf16, #tpu.memory_space<vmem>>, vector<1024x256xbf16>
    %cst = arith.constant dense<0.000000e+00> : vector<64x256xf32>
    %2 = tpu.matmul %0, %1, %cst {dimension_numbers = #tpu.dot_dimension_numbers<[1], [0], [0], [1], [0, 0, 1, 1], [], []>} : vector<64x1024xbf16>, vector<1024x256xbf16>, vector<64x256xf32> -> vector<64x256xf32>
    %3 = vector.extract_strided_slice %2 {offsets = [0, 0], sizes = [32, 128], strides = [1, 1]} : vector<64x256xf32> to vector<32x128xf32>
    %4 = vector.extract_strided_slice %2 {offsets = [0, 128], sizes = [32, 128], strides = [1, 1]} : vector<64x256xf32> to vector<32x128xf32>
    %5 = vector.extract_strided_slice %2 {offsets = [32, 0], sizes = [32, 128], strides = [1, 1]} : vector<64x256xf32> to vector<32x128xf32>
    %6 = vector.extract_strided_slice %2 {offsets = [32, 128], sizes = [32, 128], strides = [1, 1]} : vector<64x256xf32> to vector<32x128xf32>
    %7 = arith.mulf %3, %3 : vector<32x128xf32>
    %8 = arith.mulf %4, %4 : vector<32x128xf32>
    %9 = arith.addf %7, %8 : vector<32x128xf32>
    %cst_3 = arith.constant 9.99999993E-9 : f32
    %10 = vector.broadcast %cst_3 : f32 to vector<32x128xf32>
    %11 = arith.maximumf %9, %10 : vector<32x128xf32>
    %12 = math.sqrt %11 : vector<32x128xf32>
    %13 = arith.mulf %5, %5 : vector<32x128xf32>
    %14 = arith.mulf %6, %6 : vector<32x128xf32>
    %15 = arith.addf %13, %14 : vector<32x128xf32>
    %cst_4 = arith.constant 9.99999993E-9 : f32
    %16 = vector.broadcast %cst_4 : f32 to vector<32x128xf32>
    %17 = arith.maximumf %15, %16 : vector<32x128xf32>
    %18 = math.sqrt %17 : vector<32x128xf32>
    %19 = arith.addf %3, %5 : vector<32x128xf32>
    %20 = arith.addf %4, %6 : vector<32x128xf32>
    %21 = arith.mulf %19, %19 : vector<32x128xf32>
    %22 = arith.mulf %20, %20 : vector<32x128xf32>
    %23 = arith.addf %21, %22 : vector<32x128xf32>
    %cst_5 = arith.constant 9.99999993E-9 : f32
    %24 = vector.broadcast %cst_5 : f32 to vector<32x128xf32>
    %25 = arith.maximumf %23, %24 : vector<32x128xf32>
    %26 = math.sqrt %25 : vector<32x128xf32>
    %27 = arith.addf %12, %18 : vector<32x128xf32>
    %28 = arith.subf %27, %26 : vector<32x128xf32>
    %c32_i32 = arith.constant 32 : i32
    %29 = arith.muli %arg0, %c32_i32 : i32
    %30 = tpu.iota {dimensions = array<i32: 0>} : vector<32x1xi32>
    %31 = vector.broadcast %29 : i32 to vector<32x1xi32>
    %32 = arith.addi %31, %30 : vector<32x1xi32>
    %c72_i32 = arith.constant 72 : i32
    %33 = vector.broadcast %c72_i32 : i32 to vector<32x1xi32>
    %34 = arith.cmpi slt, %32, %33 : vector<32x1xi32>
    %35 = arith.mulf %28, %28 : vector<32x128xf32>
    %cst_6 = arith.constant 0.000000e+00 : f32
    %36 = vector.shape_cast %34 : vector<32x1xi1> to vector<32x1xi1>
    %37 = vector.broadcast %36 : vector<32x1xi1> to vector<32x128xi1>
    %38 = vector.broadcast %cst_6 : f32 to vector<32x128xf32>
    %39 = arith.select %37, %35, %38 : vector<32x128xi1>, vector<32x128xf32>
    %cst_7 = arith.constant dense<0.000000e+00> : vector<128xf32>
    %40 = vector.multi_reduction <add>, %39, %cst_7 [0] : vector<32x128xf32> to vector<128xf32>
    %41 = vector.shape_cast %40 : vector<128xf32> to vector<1x128xf32>
    %42 = vector.shape_cast %41 : vector<1x128xf32> to vector<1x1x128xf32>
    %c0_8 = arith.constant 0 : index
    %c0_9 = arith.constant 0 : index
    %c0_10 = arith.constant 0 : index
    %43 = vector.load %arg3[%c0_8, %c0_9, %c0_10] : memref<1x1x128xf32, #tpu.memory_space<vmem>>, vector<1x1x128xf32>
    tpu.vector_store %arg3[%c0_8, %c0_9, %c0_10], %42 {strides = array<i32>} : memref<1x1x128xf32, #tpu.memory_space<vmem>>, vector<1x1x128xf32>,
    return
  }
  func.func @transform_0(%arg0: i32) -> (i32, i32) {
    %c0_i32 = arith.constant 0 : i32
    %c0_i32_0 = arith.constant 0 : i32
    return %arg0, %c0_i32 : i32, i32
  }
  func.func @transform_1(%arg0: i32) -> (i32, i32) {
    %c0_i32 = arith.constant 0 : i32
    %c0_i32_0 = arith.constant 0 : i32
    %c0_i32_1 = arith.constant 0 : i32
    return %c0_i32, %c0_i32_0 : i32, i32
  }
  func.func @transform_2(%arg0: i32) -> (i32, i32, i32) {
    %c0_i32 = arith.constant 0 : i32
    %c0_i32_0 = arith.constant 0 : i32
    %c0_i32_1 = arith.constant 0 : i32
    return %arg0, %c0_i32, %c0_i32_0 : i32, i32, i32
  }
}

</mosaic_0001>

<bundles_post_ra>
// kernel: _stft_loss_fwd.1
= control target key start
LH: loop header
LB: loop body
LE: loop exit
PB: predicated region body
PF: predicated region fallthrough
CT: control target
= control target key end

     0   :  { %s2732_s9 = smov 0   ;;  %s4009_s0 = inlined_call_operand.vmem [shape: bf16[192,1024], index: 0, kind: input, shape index: {}]   ;;  %s4010_s1 = inlined_call_operand.vmem [shape: bf16[1024,256], index: 1, kind: input, shape index: {}]   ;;  %s4011_s2 = inlined_call_operand.vmem [shape: f32[3,1,128], index: 2, kind: output, shape index: {}]  }
   0x1 LB: > { %s2738_s10 = sadd.s32 4294967295, %s2715_s9   ;;  %p1869_p0 = scmp.ge.s32.totalorder %s2715_s9, 1  ;;  %s2715_s9 = sphi %s2732_s9, %s12_s9  }
   0x2   : > { %p114_p1 = scmp.lt.s32.totalorder %s2715_s9, 4 }
   0x4   : > { %p115_p2 = pnand %p1869_p0, %p114_p1 }
   0x5   : > { %s1870_s15 = sshll.u32 (!%p115_p2), %s2738_s10, 3  ;;  %s2513_s20 = sshll.u32 (!%p115_p2), %s2738_s10, 5 }
   0x6   : > { %118 = sbr.rel (%p115_p2) target bundleno = 483 (0x1e3), region = 28  ;;  %p136_p3 = scmp.lt.s32.totalorder (!%p115_p2), %s1870_s15, 23 }
   0x7   : > { %p142_p4 = scmp.lt.s32.totalorder (!%p115_p2), %s2738_s10, 2 }
   0xb   : > { %v2059_v0 = vld [vmem:[%s4010_s1 + $0x70] sm:$0xf]  ;;  %v2564_v1 = vld [vmem:[%s4010_s1 + $0x74] sm:$0xf0]  ;;  %v2051_v11 = vld [vmem:[%s4010_s1 + $0x60] sm:$0xf] }
   0xc   : > { %v2123_v2 = vld [vmem:[%s4010_s1 + $0xf0] sm:$0xf]  ;;  %v2060_v3 = vor.u32 %v2564_v1, %v2059_v0  ;;  %v2580_v4 = vld [vmem:[%s4010_s1 + $0xf4] sm:$0xf0]  ;;  %v2562_v13 = vld [vmem:[%s4010_s1 + $0x64] sm:$0xf0] }
   0xd   : > { %v2187_v5 = vld [vmem:[%s4010_s1 + $0x170] sm:$0xf]  ;;  %v2596_v6 = vld [vmem:[%s4010_s1 + $0x174] sm:$0xf0]  ;;  %v2124_v7 = vor.u32 %v2580_v4, %v2123_v2  ;;  %v2115_v14 = vld [vmem:[%s4010_s1 + $0xe0] sm:$0xf]  ;;  %v2052_v16 = vor.u32 %v2562_v13, %v2051_v11 }
   0xe   : > { %v2188_v8 = vor.u32 %v2596_v6, %v2187_v5  ;;  %v2251_v9 = vld [vmem:[%s4010_s1 + $0x1f0] sm:$0xf]  ;;  %v2612_v10 = vld [vmem:[%s4010_s1 + $0x1f4] sm:$0xf0]  ;;  %1105 = vmatpush.bf16.msra.mxu0 %v2060_v3  ;;  %v2578_v15 = vld [vmem:[%s4010_s1 + $0xe4] sm:$0xf0] }
   0xf   : > { %v2252_v12 = vor.u32 %v2612_v10, %v2251_v9  ;;  %1134 = vmatpush.bf16.msra.mxu1 %v2124_v7  ;;  %v2116_v17 = vor.u32 %v2578_v15, %v2115_v14  ;;  %v2179_v18 = vld [vmem:[%s4010_s1 + $0x160] sm:$0xf]  ;;  %v2594_v19 = vld [vmem:[%s4010_s1 + $0x164] sm:$0xf0]  ;;  %v2043_v23 = vld [vmem:[%s4010_s1 + $0x50] sm:$0xf] }
  0x10   : > { %1163 = vmatpush.bf16.msra.mxu2 %v2188_v8  ;;  %v2243_v20 = vld [vmem:[%s4010_s1 + $0x1e0] sm:$0xf]  ;;  %v2180_v21 = vor.u32 %v2594_v19, %v2179_v18  ;;  %v2610_v22 = vld [vmem:[%s4010_s1 + $0x1e4] sm:$0xf0]  ;;  %v2560_v24 = vld [vmem:[%s4010_s1 + $0x54] sm:$0xf0] }
  0x11   : > { %1192 = vmatpush.bf16.msra.mxu3 %v2252_v12  ;;  %v2244_v25 = vor.u32 %v2610_v22, %v2243_v20  ;;  %v2107_v26 = vld [vmem:[%s4010_s1 + $0xd0] sm:$0xf]  ;;  %v2576_v27 = vld [vmem:[%s4010_s1 + $0xd4] sm:$0xf0]  ;;  %v2044_v29 = vor.u32 %v2560_v24, %v2043_v23  ;;  %v2035_v35 = vld [vmem:[%s4010_s1 + $0x40] sm:$0xf] }
  0x12   : > { %v2171_v28 = vld [vmem:[%s4010_s1 + $0x150] sm:$0xf]  ;;  %1106 = vmatpush.bf16.msra.mxu0 %v2052_v16  ;;  %v2592_v30 = vld [vmem:[%s4010_s1 + $0x154] sm:$0xf0]  ;;  %v2108_v33 = vor.u32 %v2576_v27, %v2107_v26  ;;  %v2558_v36 = vld [vmem:[%s4010_s1 + $0x44] sm:$0xf0] }
  0x13   : > { %v2235_v31 = vld [vmem:[%s4010_s1 + $0x1d0] sm:$0xf]  ;;  %v2608_v32 = vld [vmem:[%s4010_s1 + $0x1d4] sm:$0xf0]  ;;  %1135 = vmatpush.bf16.msra.mxu1 %v2116_v17  ;;  %v2172_v34 = vor.u32 %v2592_v30, %v2171_v28  ;;  %v2099_v37 = vld [vmem:[%s4010_s1 + $0xc0] sm:$0xf]  ;;  %v2036_v44 = vor.u32 %v2558_v36, %v2035_v35 }
  0x14   : > { %1164 = vmatpush.bf16.msra.mxu2 %v2180_v21  ;;  %v2236_v38 = vor.u32 %v2608_v32, %v2235_v31  ;;  %v2574_v39 = vld [vmem:[%s4010_s1 + $0xc4] sm:$0xf0]  ;;  %v2163_v40 = vld [vmem:[%s4010_s1 + $0x140] sm:$0xf]  ;;  %v2027_v47 = vld [vmem:[%s4010_s1 + $0x30] sm:$0xf] }
  0x15   : > { %1193 = vmatpush.bf16.msra.mxu3 %v2244_v25  ;;  %v2590_v41 = vld [vmem:[%s4010_s1 + $0x144] sm:$0xf0]  ;;  %v2227_v42 = vld [vmem:[%s4010_s1 + $0x1c0] sm:$0xf]  ;;  %v2100_v45 = vor.u32 %v2574_v39, %v2099_v37  ;;  %v2556_v48 = vld [vmem:[%s4010_s1 + $0x34] sm:$0xf0] }
  0x16   : > { %v2606_v43 = vld [vmem:[%s4010_s1 + $0x1c4] sm:$0xf0]  ;;  %1107 = vmatpush.bf16.msra.mxu0 %v2044_v29  ;;  %v2164_v46 = vor.u32 %v2590_v41, %v2163_v40  ;;  %v2091_v49 = vld [vmem:[%s4010_s1 + $0xb0] sm:$0xf]  ;;  %v2572_v51 = vld [vmem:[%s4010_s1 + $0xb4] sm:$0xf0]  ;;  %v2028_v56 = vor.u32 %v2556_v48, %v2027_v47 }
  0x17   : > { %1136 = vmatpush.bf16.msra.mxu1 %v2108_v33  ;;  %v2228_v50 = vor.u32 %v2606_v43, %v2227_v42  ;;  %v2155_v52 = vld [vmem:[%s4010_s1 + $0x130] sm:$0xf]  ;;  %v2588_v53 = vld [vmem:[%s4010_s1 + $0x134] sm:$0xf0]  ;;  %v2092_v57 = vor.u32 %v2572_v51, %v2091_v49  ;;  %v2019_v59 = vld [vmem:[%s4010_s1 + $0x20] sm:$0xf] }
  0x18   : > { %1165 = vmatpush.bf16.msra.mxu2 %v2172_v34  ;;  %v2219_v54 = vld [vmem:[%s4010_s1 + $0x1b0] sm:$0xf]  ;;  %v2604_v55 = vld [vmem:[%s4010_s1 + $0x1b4] sm:$0xf0]  ;;  %v2156_v58 = vor.u32 %v2588_v53, %v2155_v52  ;;  %v2554_v60 = vld [vmem:[%s4010_s1 + $0x24] sm:$0xf0] }
  0x19   : > { %1194 = vmatpush.bf16.msra.mxu3 %v2236_v38  ;;  %v2083_v61 = vld [vmem:[%s4010_s1 + $0xa0] sm:$0xf]  ;;  %v2220_v62 = vor.u32 %v2604_v55, %v2219_v54  ;;  %v2570_v63 = vld [vmem:[%s4010_s1 + $0xa4] sm:$0xf0]  ;;  %v2020_v4 = vor.u32 %v2554_v60, %v2019_v59  ;;  %v2011_v5 = vld [vmem:[%s4010_s1 + $0x10] sm:$0xf] }
  0x1a   : > { %1108 = vmatpush.bf16.msra.mxu0 %v2036_v44  ;;  %v2147_v0 = vld [vmem:[%s4010_s1 + $0x120] sm:$0xf]  ;;  %v2586_v1 = vld [vmem:[%s4010_s1 + $0x124] sm:$0xf0]  ;;  %v2084_v6 = vor.u32 %v2570_v63, %v2083_v61  ;;  %v2552_v8 = vld [vmem:[%s4010_s1 + $0x14] sm:$0xf0] }
  0x1b   : > { %1137 = vmatpush.bf16.msra.mxu1 %v2100_v45  ;;  %v2211_v2 = vld [vmem:[%s4010_s1 + $0x1a0] sm:$0xf]  ;;  %v2602_v3 = vld [vmem:[%s4010_s1 + $0x1a4] sm:$0xf0]  ;;  %v2148_v7 = vor.u32 %v2586_v1, %v2147_v0  ;;  %v2075_v9 = vld [vmem:[%s4010_s1 + $0x90] sm:$0xf]  ;;  %v2012_v16 = vor.u32 %v2552_v8, %v2011_v5 }
  0x1c   : > { %1166 = vmatpush.bf16.msra.mxu2 %v2164_v46  ;;  %v2568_v10 = vld [vmem:[%s4010_s1 + $0x94] sm:$0xf0]  ;;  %v2212_v11 = vor.u32 %v2602_v3, %v2211_v2  ;;  %v2139_v12 = vld [vmem:[%s4010_s1 + $0x110] sm:$0xf]  ;;  %v2003_v17 = vld [vmem:[%s4010_s1] sm:$0xf] }
  0x1d   : > { %1195 = vmatpush.bf16.msra.mxu3 %v2228_v50  ;;  %v2584_v13 = vld [vmem:[%s4010_s1 + $0x114] sm:$0xf0]  ;;  %v2203_v14 = vld [vmem:[%s4010_s1 + $0x190] sm:$0xf]  ;;  %v2550_v18 = vld [vmem:[%s4010_s1 + $0x4] sm:$0xf0]  ;;  %v2076_v20 = vor.u32 %v2568_v10, %v2075_v9 }
  0x1e   : > { %1109 = vmatpush.bf16.msra.mxu0 %v2028_v56  ;;  %v2600_v15 = vld [vmem:[%s4010_s1 + $0x194] sm:$0xf0]  ;;  %v2067_v19 = vld [vmem:[%s4010_s1 + $0x80] sm:$0xf]  ;;  %v2140_v21 = vor.u32 %v2584_v13, %v2139_v12  ;;  %v2566_v22 = vld [vmem:[%s4010_s1 + $0x84] sm:$0xf0]  ;;  %v2004_v30 = vor.u32 %v2550_v18, %v2003_v17 }
  0x1f   : > { %1138 = vmatpush.bf16.msra.mxu1 %v2092_v57  ;;  %v2131_v23 = vld [vmem:[%s4010_s1 + $0x100] sm:$0xf]  ;;  %s4013_s15 = smov (!%p136_p3, %s1870_s15), 23  ;;  %v2204_v24 = vor.u32 %v2600_v15, %v2203_v14  ;;  %v2582_v25 = vld [vmem:[%s4010_s1 + $0x104] sm:$0xf0]  ;;  %v2068_v35 = vor.u32 %v2566_v22, %v2067_v19  ;;  %s4015_s10 = smov (!%p142_p4, %s2738_s10), 2 }
  0x20   : > { %1167 = vmatpush.bf16.msra.mxu2 %v2156_v58  ;;  %v2195_v26 = vld [vmem:[%s4010_s1 + $0x180] sm:$0xf]  ;;  %v2598_v27 = vld [vmem:[%s4010_s1 + $0x184] sm:$0xf0]  ;;  %s2516_s8 = sshll.u32 %s4013_s15, 5  ;;  %v2132_v36 = vor.u32 %v2582_v25, %v2131_v23  ;;  %s144_s22 = scalar_lea.vmem %s4011_s2, %s4015_s10 }
  0x21   : > { %1196 = vmatpush.bf16.msra.mxu3 %v2220_v62  ;;  %v2443_v28 = vld [vmem:[%s4010_s1 + $0x370] sm:$0xf]  ;;  %v2660_v29 = vld [vmem:[%s4010_s1 + $0x374] sm:$0xf0]  ;;  %s2944_s18 = scalar_lea.vmem %s4009_s0, %s2516_s8  ;;  %v2435_v42 = vld [vmem:[%s4010_s1 + $0x360] sm:$0xf]  ;;  %v2196_v43 = vor.u32 %v2598_v27, %v2195_v26 }
  0x22   : > { %1110 = vmatpush.bf16.msra.mxu0 %v2020_v4  ;;  %v2315_v31 = vld [vmem:[%s4010_s1 + $0x270] sm:$0xf]  ;;  %v2628_v32 = vld [vmem:[%s4010_s1 + $0x274] sm:$0xf0]  ;;  %v1875_v37 = vld [vmem:[%s2944_s18] sm:$0xf]  ;;  %v2444_v47 = vor.u32 %v2660_v29, %v2443_v28 }
  0x23   : > { %1139 = vmatpush.bf16.msra.mxu1 %v2084_v6  ;;  %v2507_v33 = vld [vmem:[%s4010_s1 + $0x3f0] sm:$0xf]  ;;  %v2676_v34 = vld [vmem:[%s4010_s1 + $0x3f4] sm:$0xf0]  ;;  %v2521_v38 = vld [vmem:[%s2944_s18 + $0x1c] sm:$0xf0]  ;;  %v2316_v58 = vor.u32 %v2628_v32, %v2315_v31 }
  0x24   : > { %1168 = vmatpush.bf16.msra.mxu2 %v2148_v7  ;;  %v2517_v39 = vld [vmem:[%s2944_s18 + $0x4] sm:$0xf]  ;;  %v2379_v40 = vld [vmem:[%s4010_s1 + $0x2f0] sm:$0xf]  ;;  %v2644_v41 = vld [vmem:[%s4010_s1 + $0x2f4] sm:$0xf0]  ;;  %v2973_v48 = vor.u32 %v2521_v38, %v1875_v37  ;;  %v2508_v51 = vor.u32 %v2676_v34, %v2507_v33 }
  0x25   : > { %1197 = vmatpush.bf16.msra.mxu3 %v2212_v11  ;;  %v1877_v44 = vld [vmem:[%s2944_s18 + $0x20] sm:$0xf0]  ;;  %v1883_v45 = vld [vmem:[%s2944_s18 + $0x8] sm:$0xf]  ;;  %v2518_v49 = vld [vmem:[%s2944_s18 + $0xc] sm:$0xf]  ;;  %v2380_v59 = vor.u32 %v2644_v41, %v2379_v40 }
  0x26   : > { %1111 = vmatpush.bf16.msra.mxu0 %v2012_v16  ;;  %v2522_v46 = vld [vmem:[%s2944_s18 + $0x24] sm:$0xf0]  ;;  %v1885_v50 = vld [vmem:[%s2944_s18 + $0x28] sm:$0xf0]  ;;  %v2980_v53 = vor.u32 %v2517_v39, %v1877_v44  ;;  %v2499_v55 = vld [vmem:[%s4010_s1 + $0x3e0] sm:$0xf] }
  0x27   : > { %1140 = vmatpush.bf16.msra.mxu1 %v2076_v20  ;;  %v2658_v52 = vld [vmem:[%s4010_s1 + $0x364] sm:$0xf0]  ;;  %v2982_v54 = vor.u32 %v2522_v46, %v1883_v45  ;;  %v2990_v57 = vor.u32 %v2518_v49, %v1885_v50  ;;  %v2307_v61 = vld [vmem:[%s4010_s1 + $0x260] sm:$0xf]  ;;  %v2427_v2 = vld [vmem:[%s4010_s1 + $0x350] sm:$0xf] }
  0x28   : > { %1169 = vmatpush.bf16.msra.mxu2 %v2140_v21  ;;  %v2674_v56 = vld [vmem:[%s4010_s1 + $0x3e4] sm:$0xf0]  ;;  %v2436_v60 = vor.u32 %v2658_v52, %v2435_v42  ;;  %v2371_v63 = vld [vmem:[%s4010_s1 + $0x2e0] sm:$0xf]  ;;  %v2656_v3 = vld [vmem:[%s4010_s1 + $0x354] sm:$0xf0] }
  0x29   : > { %1198 = vmatpush.bf16.msra.mxu3 %v2204_v24  ;;  %v2626_v62 = vld [vmem:[%s4010_s1 + $0x264] sm:$0xf0]  ;;  %v2500_v0 = vor.u32 %v2674_v56, %v2499_v55  ;;  %v2491_v4 = vld [vmem:[%s4010_s1 + $0x3d0] sm:$0xf]  ;;  %v2672_v5 = vld [vmem:[%s4010_s1 + $0x3d4] sm:$0xf0]  ;;  %v2428_v8 = vor.u32 %v2656_v3, %v2427_v2 }
  0x2a   : > { %1112 = vmatpush.bf16.msra.mxu0 %v2004_v30  ;;  %v2642_v1 = vld [vmem:[%s4010_s1 + $0x2e4] sm:$0xf0]  ;;  %v2308_v6 = vor.u32 %v2626_v62, %v2307_v61  ;;  %v2299_v9 = vld [vmem:[%s4010_s1 + $0x250] sm:$0xf]  ;;  %v2624_v10 = vld [vmem:[%s4010_s1 + $0x254] sm:$0xf0]  ;;  %v2492_v12 = vor.u32 %v2672_v5, %v2491_v4 }
  0x2b   : > { %1141 = vmatpush.bf16.msra.mxu1 %v2068_v35  ;;  %v2372_v7 = vor.u32 %v2642_v1, %v2371_v63  ;;  %v2363_v11 = vld [vmem:[%s4010_s1 + $0x2d0] sm:$0xf]  ;;  %v2640_v13 = vld [vmem:[%s4010_s1 + $0x2d4] sm:$0xf0]  ;;  %v2419_v14 = vld [vmem:[%s4010_s1 + $0x340] sm:$0xf]  ;;  %v2300_v18 = vor.u32 %v2624_v10, %v2299_v9 }
  0x2c   : > { %1170 = vmatpush.bf16.msra.mxu2 %v2132_v36  ;;  %v2654_v15 = vld [vmem:[%s4010_s1 + $0x344] sm:$0xf0]  ;;  %v2483_v16 = vld [vmem:[%s4010_s1 + $0x3c0] sm:$0xf]  ;;  %v2364_v21 = vor.u32 %v2640_v13, %v2363_v11  ;;  %v2525_v26 = vld [vmem:[%s2944_s18 + $0x44] sm:$0xf] }
  0x2d   : > { %1199 = vmatpush.bf16.msra.mxu3 %v2196_v43  ;;  %1113 = vmatmul.bf16.vlgmr.msra.gmra.mxu0 %v2973_v48  ;;  %v2670_v17 = vld [vmem:[%s4010_s1 + $0x3c4] sm:$0xf0]  ;;  %v1907_v19 = vld [vmem:[%s2944_s18 + $0x40] sm:$0xf]  ;;  %v2420_v22 = vor.u32 %v2654_v15, %v2419_v14  ;;  %v1909_v27 = vld [vmem:[%s2944_s18 + $0x60] sm:$0xf0] }
  0x2e   : > { %1142 = vmatmul.bf16.vlgmr.msra.gmra.mxu1 %v2980_v53  ;;  %1221 = vmatpush.bf16.msrb.mxu0 %v2316_v58  ;;  %v2529_v20 = vld [vmem:[%s2944_s18 + $0x5c] sm:$0xf0]  ;;  %v2622_v24 = vld [vmem:[%s4010_s1 + $0x244] sm:$0xf0]  ;;  %v2484_v28 = vor.u32 %v2670_v17, %v2483_v16  ;;  %v2411_v30 = vld [vmem:[%s4010_s1 + $0x330] sm:$0xf]  ;;  %v3096_v50 = vor.u32 %v2525_v26, %v1909_v27 }
  0x2f   : > { %1171 = vmatmul.bf16.vlgmr.msra.gmra.mxu2 %v2982_v54  ;;  %1250 = vmatpush.bf16.msrb.mxu1 %v2380_v59  ;;  %v2291_v23 = vld [vmem:[%s4010_s1 + $0x240] sm:$0xf]  ;;  %v2638_v29 = vld [vmem:[%s4010_s1 + $0x2c4] sm:$0xf0]  ;;  %v2652_v31 = vld [vmem:[%s4010_s1 + $0x334] sm:$0xf0]  ;;  %v3085_v44 = vor.u32 %v2529_v20, %v1907_v19 }
  0x30   : > { %1279 = vmatpush.bf16.msrb.mxu2 %v2444_v47  ;;  %1200 = vmatmul.bf16.vlgmr.msra.gmra.mxu3 %v2990_v57  ;;  %v2355_v25 = vld [vmem:[%s4010_s1 + $0x2c0] sm:$0xf]  ;;  %v1915_v32 = vld [vmem:[%s2944_s18 + $0x48] sm:$0xf]  ;;  %v2475_v33 = vld [vmem:[%s4010_s1 + $0x3b0] sm:$0xf]  ;;  %v2292_v38 = vor.u32 %v2622_v24, %v2291_v23  ;;  %v2412_v40 = vor.u32 %v2652_v31, %v2411_v30 }
  0x31   : > { %1308 = vmatpush.bf16.msrb.mxu3 %v2508_v51  ;;  %v2668_v34 = vld [vmem:[%s4010_s1 + $0x3b4] sm:$0xf0]  ;;  %v2530_v35 = vld [vmem:[%s2944_s18 + $0x64] sm:$0xf0]  ;;  %v2526_v36 = vld [vmem:[%s2944_s18 + $0x4c] sm:$0xf]  ;;  %v2356_v39 = vor.u32 %v2638_v29, %v2355_v25 }
  0x32   : > { %1222 = vmatpush.bf16.msrb.mxu0 %v2308_v6  ;;  %v1917_v37 = vld [vmem:[%s2944_s18 + $0x68] sm:$0xf0]  ;;  %v2283_v41 = vld [vmem:[%s4010_s1 + $0x230] sm:$0xf]  ;;  %v2620_v42 = vld [vmem:[%s4010_s1 + $0x234] sm:$0xf0]  ;;  %v2476_v45 = vor.u32 %v2668_v34, %v2475_v33  ;;  %v3098_v51 = vor.u32 %v2530_v35, %v1915_v32 }
  0x33   : > { %1251 = vmatpush.bf16.msrb.mxu1 %v2372_v7  ;;  %v2347_v43 = vld [vmem:[%s4010_s1 + $0x2b0] sm:$0xf]  ;;  %v2636_v46 = vld [vmem:[%s4010_s1 + $0x2b4] sm:$0xf0]  ;;  %v2403_v47 = vld [vmem:[%s4010_s1 + $0x320] sm:$0xf]  ;;  %v3106_v56 = vor.u32 %v2526_v36, %v1917_v37  ;;  %v2284_v58 = vor.u32 %v2620_v42, %v2283_v41 }
  0x34   : > { %1280 = vmatpush.bf16.msrb.mxu2 %v2436_v60  ;;  %v2650_v49 = vld [vmem:[%s4010_s1 + $0x324] sm:$0xf0]  ;;  %v2467_v52 = vld [vmem:[%s4010_s1 + $0x3a0] sm:$0xf]  ;;  %v2348_v59 = vor.u32 %v2636_v46, %v2347_v43  ;;  %v2395_v3 = vld [vmem:[%s4010_s1 + $0x310] sm:$0xf] }
  0x35   : > { %1309 = vmatpush.bf16.msrb.mxu3 %v2500_v0  ;;  %v2666_v55 = vld [vmem:[%s4010_s1 + $0x3a4] sm:$0xf0]  ;;  %v2404_v60 = vor.u32 %v2650_v49, %v2403_v47  ;;  %v2275_v61 = vld [vmem:[%s4010_s1 + $0x220] sm:$0xf]  ;;  %v2648_v4 = vld [vmem:[%s4010_s1 + $0x314] sm:$0xf0] }
  0x36   : > { %1223 = vmatpush.bf16.msrb.mxu0 %v2300_v18  ;;  %v2618_v62 = vld [vmem:[%s4010_s1 + $0x224] sm:$0xf0]  ;;  %v2468_v63 = vor.u32 %v2666_v55, %v2467_v52  ;;  %v2339_v0 = vld [vmem:[%s4010_s1 + $0x2a0] sm:$0xf]  ;;  %v2267_v5 = vld [vmem:[%s4010_s1 + $0x210] sm:$0xf]  ;;  %v2396_v7 = vor.u32 %v2648_v4, %v2395_v3 }
  0x37   : > { %1252 = vmatpush.bf16.msrb.mxu1 %v2364_v21  ;;  %v2634_v1 = vld [vmem:[%s4010_s1 + $0x2a4] sm:$0xf0]  ;;  %v2276_v2 = vor.u32 %v2618_v62, %v2275_v61  ;;  %v2459_v9 = vld [vmem:[%s4010_s1 + $0x390] sm:$0xf]  ;;  %v2664_v10 = vld [vmem:[%s4010_s1 + $0x394] sm:$0xf0] }
  0x38   : > { %1281 = vmatpush.bf16.msrb.mxu2 %v2428_v8  ;;  %v2340_v6 = vor.u32 %v2634_v1, %v2339_v0  ;;  %v2616_v8 = vld [vmem:[%s4010_s1 + $0x214] sm:$0xf0]  ;;  %v2460_v11 = vor.u32 %v2664_v10, %v2459_v9  ;;  %v2387_v14 = vld [vmem:[%s4010_s1 + $0x300] sm:$0xf]  ;;  %v2646_v15 = vld [vmem:[%s4010_s1 + $0x304] sm:$0xf0] }
  0x39   : > { %1310 = vmatpush.bf16.msrb.mxu3 %v2492_v12  ;;  %v2331_v12 = vld [vmem:[%s4010_s1 + $0x290] sm:$0xf]  ;;  %v2632_v13 = vld [vmem:[%s4010_s1 + $0x294] sm:$0xf0]  ;;  %v2268_v16 = vor.u32 %v2616_v8, %v2267_v5  ;;  %v2451_v17 = vld [vmem:[%s4010_s1 + $0x380] sm:$0xf]  ;;  %v2388_v20 = vor.u32 %v2646_v15, %v2387_v14 }
  0x3a   : > { %1224 = vmatpush.bf16.msrb.mxu0 %v2292_v38  ;;  %v2662_v18 = vld [vmem:[%s4010_s1 + $0x384] sm:$0xf0]  ;;  %v2332_v19 = vor.u32 %v2632_v13, %v2331_v12  ;;  %v2259_v21 = vld [vmem:[%s4010_s1 + $0x200] sm:$0xf]  ;;  %v1941_v29 = vld [vmem:[%s2944_s18 + $0xa0] sm:$0xf0] }
  0x3b   : > { %1253 = vmatpush.bf16.msrb.mxu1 %v2356_v39  ;;  %v2452_v23 = vor.u32 %v2662_v18, %v2451_v17  ;;  %v2323_v24 = vld [vmem:[%s4010_s1 + $0x280] sm:$0xf]  ;;  %v2630_v25 = vld [vmem:[%s4010_s1 + $0x284] sm:$0xf0]  ;;  %v2534_v33 = vld [vmem:[%s2944_s18 + $0x8c] sm:$0xf] }
  0x3c   : > { %1282 = vmatpush.bf16.msrb.mxu2 %v2420_v22  ;;  %v2614_v22 = vld [vmem:[%s4010_s1 + $0x204] sm:$0xf0]  ;;  %v1939_v26 = vld [vmem:[%s2944_s18 + $0x80] sm:$0xf]  ;;  %v1949_v34 = vld [vmem:[%s2944_s18 + $0xa8] sm:$0xf0]  ;;  %v2324_v35 = vor.u32 %v2630_v25, %v2323_v24 }
  0x3d   : > { %1311 = vmatpush.bf16.msrb.mxu3 %v2484_v28  ;;  %1118 = vmatmul.bf16.gmra.mxu0 %v3085_v44  ;;  %v2537_v27 = vld [vmem:[%s2944_s18 + $0x9c] sm:$0xf0]  ;;  %v2533_v28 = vld [vmem:[%s2944_s18 + $0x84] sm:$0xf]  ;;  %v1947_v30 = vld [vmem:[%s2944_s18 + $0x88] sm:$0xf]  ;;  %v2260_v32 = vor.u32 %v2614_v22, %v2259_v21  ;;  %v3186_v39 = vor.u32 %v2534_v33, %v1949_v34 }
  0x3e   : > { %1147 = vmatmul.bf16.gmra.mxu1 %v3096_v50  ;;  %1225 = vmatpush.bf16.msrb.mxu0 %v2284_v58  ;;  %v2538_v31 = vld [vmem:[%s2944_s18 + $0xa4] sm:$0xf0]  ;;  %v3180_v36 = vor.u32 %v2537_v27, %v1939_v26  ;;  %v3182_v37 = vor.u32 %v2533_v28, %v1941_v29  ;;  %v2189_v41 = vld [vmem:[%s4010_s1 + $0x178] sm:$0xf0]  ;;  %v2563_v42 = vld [vmem:[%s4010_s1 + $0x74] sm:$0xf] }
  0x3f   : > { %1176 = vmatmul.bf16.gmra.mxu2 %v3098_v51  ;;  %1254 = vmatpush.bf16.msrb.mxu1 %v2348_v59  ;;  %v3184_v38 = vor.u32 %v2538_v31, %v1947_v30  ;;  %v2611_v46 = vld [vmem:[%s4010_s1 + $0x1f4] sm:$0xf]  ;;  %v2253_v47 = vld [vmem:[%s4010_s1 + $0x1f8] sm:$0xf0]  ;;  %v2593_v59 = vld [vmem:[%s4010_s1 + $0x164] sm:$0xf] }
  0x40   : > { %1283 = vmatpush.bf16.msrb.mxu2 %v2412_v40  ;;  %1205 = vmatmul.bf16.gmra.mxu3 %v3106_v56  ;;  %v2595_v40 = vld [vmem:[%s4010_s1 + $0x174] sm:$0xf]  ;;  %v2256_v52 = vor.u32 %v2611_v46, %v2253_v47  ;;  %v2125_v58 = vld [vmem:[%s4010_s1 + $0xf8] sm:$0xf0]  ;;  %v2181_v61 = vld [vmem:[%s4010_s1 + $0x168] sm:$0xf0] }
  0x41   : > { %1312 = vmatpush.bf16.msrb.mxu3 %v2476_v45  ;;  %v2192_v43 = vor.u32 %v2595_v40, %v2189_v41  ;;  %v2061_v45 = vld [vmem:[%s4010_s1 + $0x78] sm:$0xf0]  ;;  %v2579_v55 = vld [vmem:[%s4010_s1 + $0xf4] sm:$0xf]  ;;  %v2561_v62 = vld [vmem:[%s4010_s1 + $0x64] sm:$0xf]  ;;  %v2184_v0 = vor.u32 %v2593_v59, %v2181_v61 }
  0x42   : > { %1226 = vmatpush.bf16.msrb.mxu0 %v2276_v2  ;;  %v2064_v49 = vor.u32 %v2563_v42, %v2061_v45  ;;  %v2609_v2 = vld [vmem:[%s4010_s1 + $0x1e4] sm:$0xf]  ;;  %v2245_v3 = vld [vmem:[%s4010_s1 + $0x1e8] sm:$0xf0]  ;;  %v1971_v8 = vld [vmem:[%s2944_s18 + $0xc0] sm:$0xf] }
  0x43   : > { %1255 = vmatpush.bf16.msrb.mxu1 %v2340_v6  ;;  %v2577_v4 = vld [vmem:[%s4010_s1 + $0xe4] sm:$0xf]  ;;  %v2248_v5 = vor.u32 %v2609_v2, %v2245_v3  ;;  %v2117_v6 = vld [vmem:[%s4010_s1 + $0xe8] sm:$0xf0]  ;;  %v2545_v9 = vld [vmem:[%s2944_s18 + $0xdc] sm:$0xf0] }
  0x44   : > { %1284 = vmatpush.bf16.msrb.mxu2 %v2404_v60  ;;  %v2128_v60 = vor.u32 %v2579_v55, %v2125_v58  ;;  %v2541_v10 = vld [vmem:[%s2944_s18 + $0xc4] sm:$0xf]  ;;  %v1979_v12 = vld [vmem:[%s2944_s18 + $0xc8] sm:$0xf]  ;;  %v2542_v14 = vld [vmem:[%s2944_s18 + $0xcc] sm:$0xf] }
  0x45   : > { %1313 = vmatpush.bf16.msrb.mxu3 %v2468_v63  ;;  %v2053_v63 = vld [vmem:[%s4010_s1 + $0x68] sm:$0xf0]  ;;  %v2546_v13 = vld [vmem:[%s2944_s18 + $0xe4] sm:$0xf0]  ;;  %v2173_v21 = vld [vmem:[%s4010_s1 + $0x158] sm:$0xf0] }
  0x46   : > { %1227 = vmatpush.bf16.msrb.mxu0 %v2268_v16  ;;  %v2056_v1 = vor.u32 %v2561_v62, %v2053_v63  ;;  %v1981_v15 = vld [vmem:[%s2944_s18 + $0xe8] sm:$0xf0]  ;;  %v3248_v16 = vor.u32 %v2545_v9, %v1971_v8  ;;  %v3252_v18 = vor.u32 %v2546_v13, %v1979_v12  ;;  %v2559_v22 = vld [vmem:[%s4010_s1 + $0x54] sm:$0xf]  ;;  %v2045_v24 = vld [vmem:[%s4010_s1 + $0x58] sm:$0xf0] }
  0x47   : > { %1256 = vmatpush.bf16.msrb.mxu1 %v2332_v19  ;;  %v3254_v19 = vor.u32 %v2542_v14, %v1981_v15  ;;  %v2607_v25 = vld [vmem:[%s4010_s1 + $0x1d4] sm:$0xf]  ;;  %v2237_v26 = vld [vmem:[%s4010_s1 + $0x1d8] sm:$0xf0]  ;;  %v2048_v27 = vor.u32 %v2559_v22, %v2045_v24  ;;  %v2589_v31 = vld [vmem:[%s4010_s1 + $0x144] sm:$0xf] }
  0x48   : > { %1285 = vmatpush.bf16.msrb.mxu2 %v2396_v7  ;;  %v2120_v7 = vor.u32 %v2577_v4, %v2117_v6  ;;  %v2240_v28 = vor.u32 %v2607_v25, %v2237_v26  ;;  %v2575_v29 = vld [vmem:[%s4010_s1 + $0xd4] sm:$0xf]  ;;  %v2109_v30 = vld [vmem:[%s4010_s1 + $0xd8] sm:$0xf0]  ;;  %v2165_v33 = vld [vmem:[%s4010_s1 + $0x148] sm:$0xf0] }
  0x49   : > { %1314 = vmatpush.bf16.msrb.mxu3 %v2460_v11  ;;  %v1973_v11 = vld [vmem:[%s2944_s18 + $0xe0] sm:$0xf0]  ;;  %v2168_v40 = vor.u32 %v2589_v31, %v2165_v33  ;;  %v2101_v47 = vld [vmem:[%s4010_s1 + $0xc8] sm:$0xf0]  ;;  %v2523_v55 = vld [vmem:[%s2944_s18 + $0x2c] sm:$0xf0] }
  0x4a   : > { %1228 = vmatpush.bf16.msrb.mxu0 %v2260_v32  ;;  %v3250_v17 = vor.u32 %v2541_v10, %v1973_v11  ;;  %v2112_v32 = vor.u32 %v2575_v29, %v2109_v30  ;;  %v2557_v34 = vld [vmem:[%s4010_s1 + $0x44] sm:$0xf]  ;;  %v2519_v58 = vld [vmem:[%s2944_s18 + $0x14] sm:$0xf]  ;;  %v2524_v61 = vld [vmem:[%s2944_s18 + $0x34] sm:$0xf0] }
  0x4b   : > { %1257 = vmatpush.bf16.msrb.mxu1 %v2324_v35  ;;  %v2037_v35 = vld [vmem:[%s4010_s1 + $0x48] sm:$0xf0]  ;;  %v2605_v42 = vld [vmem:[%s4010_s1 + $0x1c4] sm:$0xf]  ;;  %v1893_v59 = vld [vmem:[%s2944_s18 + $0x30] sm:$0xf0] }
  0x4c   : > { %1286 = vmatpush.bf16.msrb.mxu2 %v2388_v20  ;;  %v2591_v20 = vld [vmem:[%s4010_s1 + $0x154] sm:$0xf]  ;;  %v2040_v41 = vor.u32 %v2557_v34, %v2037_v35  ;;  %v2573_v45 = vld [vmem:[%s4010_s1 + $0xc4] sm:$0xf]  ;;  %v2520_v62 = vld [vmem:[%s2944_s18 + $0x1c] sm:$0xf] }
  0x4d   : > { %1315 = vmatpush.bf16.msrb.mxu3 %v2452_v23  ;;  %1123 = vmatmul.bf16.gmra.mxu0 %v3180_v36  ;;  %v2176_v23 = vor.u32 %v2591_v20, %v2173_v21  ;;  %v1901_v63 = vld [vmem:[%s2944_s18 + $0x38] sm:$0xf0]  ;;  %v2587_v4 = vld [vmem:[%s4010_s1 + $0x134] sm:$0xf]  ;;  %v2585_v15 = vld [vmem:[%s4010_s1 + $0x124] sm:$0xf] }
  0x4e   : > { %1152 = vmatmul.bf16.gmra.mxu1 %v3182_v37  ;;  %1337 = vmatpush.bf16.msra.mxu0 %v2064_v49  ;;  %v2104_v49 = vor.u32 %v2573_v45, %v2101_v47  ;;  %v3322_v3 = vor.u32 %v2520_v62, %v1901_v63  ;;  %v2555_v6 = vld [vmem:[%s4010_s1 + $0x34] sm:$0xf]  ;;  %v2029_v8 = vld [vmem:[%s4010_s1 + $0x38] sm:$0xf0]  ;;  %v2149_v21 = vld [vmem:[%s4010_s1 + $0x128] sm:$0xf0] }
  0x4f   : > { %1181 = vmatmul.bf16.gmra.mxu2 %v3184_v38  ;;  %1366 = vmatpush.bf16.msra.mxu1 %v2128_v60  ;;  %v1899_v60 = vld [vmem:[%s2944_s18 + $0x18] sm:$0xf]  ;;  %v2603_v9 = vld [vmem:[%s4010_s1 + $0x1b4] sm:$0xf]  ;;  %v2221_v10 = vld [vmem:[%s4010_s1 + $0x1b8] sm:$0xf0]  ;;  %v2032_v11 = vor.u32 %v2555_v6, %v2029_v8  ;;  %v2152_v24 = vor.u32 %v2585_v15, %v2149_v21 }
  0x50   : > { %1210 = vmatmul.bf16.gmra.mxu3 %v3186_v39  ;;  %1395 = vmatpush.bf16.msra.mxu2 %v2192_v43  ;;  %v2229_v43 = vld [vmem:[%s4010_s1 + $0x1c8] sm:$0xf0]  ;;  %v3320_v2 = vor.u32 %v2524_v61, %v1899_v60  ;;  %v2224_v12 = vor.u32 %v2603_v9, %v2221_v10  ;;  %v2571_v13 = vld [vmem:[%s4010_s1 + $0xb4] sm:$0xf]  ;;  %v2093_v14 = vld [vmem:[%s4010_s1 + $0xb8] sm:$0xf0] }
  0x51   : > { %1424 = vmatpush.bf16.msra.mxu3 %v2256_v52  ;;  %v2232_v46 = vor.u32 %v2605_v42, %v2229_v43  ;;  %v1891_v52 = vld [vmem:[%s2944_s18 + $0x10] sm:$0xf]  ;;  %v2096_v20 = vor.u32 %v2571_v13, %v2093_v14  ;;  %v2553_v22 = vld [vmem:[%s4010_s1 + $0x24] sm:$0xf]  ;;  %v2085_v30 = vld [vmem:[%s4010_s1 + $0xa8] sm:$0xf0] }
  0x52   : > { %1338 = vmatpush.bf16.msra.mxu0 %v2056_v1  ;;  %v3318_v1 = vor.u32 %v2519_v58, %v1893_v59  ;;  %v2601_v26 = vld [vmem:[%s4010_s1 + $0x1a4] sm:$0xf]  ;;  %v2531_v33 = vld [vmem:[%s2944_s18 + $0x6c] sm:$0xf0]  ;;  %v2527_v34 = vld [vmem:[%s2944_s18 + $0x54] sm:$0xf] }
  0x53   : > { %1367 = vmatpush.bf16.msra.mxu1 %v2120_v7  ;;  %v1925_v35 = vld [vmem:[%s2944_s18 + $0x70] sm:$0xf0]  ;;  %v2528_v42 = vld [vmem:[%s2944_s18 + $0x5c] sm:$0xf]  ;;  %v2133_v9 = vld [vmem:[%s4010_s1 + $0x108] sm:$0xf0] }
  0x54   : > { %1396 = vmatpush.bf16.msra.mxu2 %v2184_v0  ;;  %v3316_v0 = vor.u32 %v2523_v55, %v1891_v52  ;;  %v1933_v43 = vld [vmem:[%s2944_s18 + $0x78] sm:$0xf0]  ;;  %v2583_v52 = vld [vmem:[%s4010_s1 + $0x114] sm:$0xf]  ;;  %v2549_v10 = vld [vmem:[%s4010_s1 + $0x4] sm:$0xf] }
  0x55   : > { %1425 = vmatpush.bf16.msra.mxu3 %v2248_v5  ;;  %v2157_v5 = vld [vmem:[%s4010_s1 + $0x138] sm:$0xf0]  ;;  %v2551_v58 = vld [vmem:[%s4010_s1 + $0x14] sm:$0xf]  ;;  %v2597_v14 = vld [vmem:[%s4010_s1 + $0x184] sm:$0xf] }
  0x56   : > { %1339 = vmatpush.bf16.msra.mxu0 %v2048_v27  ;;  %v2160_v7 = vor.u32 %v2587_v4, %v2157_v5  ;;  %v2213_v27 = vld [vmem:[%s4010_s1 + $0x1a8] sm:$0xf0]  ;;  %v2141_v55 = vld [vmem:[%s4010_s1 + $0x118] sm:$0xf0]  ;;  %v2599_v61 = vld [vmem:[%s4010_s1 + $0x194] sm:$0xf] }
  0x57   : > { %1368 = vmatpush.bf16.msra.mxu1 %v2112_v32  ;;  %v2216_v29 = vor.u32 %v2601_v26, %v2213_v27  ;;  %v1923_v32 = vld [vmem:[%s2944_s18 + $0x50] sm:$0xf]  ;;  %v2144_v59 = vor.u32 %v2583_v52, %v2141_v55  ;;  %v2013_v60 = vld [vmem:[%s4010_s1 + $0x18] sm:$0xf0]  ;;  %v2567_v5 = vld [vmem:[%s4010_s1 + $0x94] sm:$0xf] }
  0x58   : > { %1397 = vmatpush.bf16.msra.mxu2 %v2176_v23  ;;  %v2021_v23 = vld [vmem:[%s4010_s1 + $0x28] sm:$0xf0]  ;;  %v3384_v45 = vor.u32 %v2531_v33, %v1923_v32  ;;  %v2205_v62 = vld [vmem:[%s4010_s1 + $0x198] sm:$0xf0]  ;;  %v2016_v63 = vor.u32 %v2551_v58, %v2013_v60  ;;  %v2535_v26 = vld [vmem:[%s2944_s18 + $0x94] sm:$0xf] }
  0x59   : > { %1426 = vmatpush.bf16.msra.mxu3 %v2240_v28  ;;  %v2024_v25 = vor.u32 %v2553_v22, %v2021_v23  ;;  %v2569_v28 = vld [vmem:[%s4010_s1 + $0xa4] sm:$0xf]  ;;  %v2208_v4 = vor.u32 %v2599_v61, %v2205_v62  ;;  %v2077_v6 = vld [vmem:[%s4010_s1 + $0x98] sm:$0xf0]  ;;  %v2197_v15 = vld [vmem:[%s4010_s1 + $0x188] sm:$0xf0] }
  0x5a   : > { %1340 = vmatpush.bf16.msra.mxu0 %v2040_v41  ;;  %v2088_v31 = vor.u32 %v2569_v28, %v2085_v30  ;;  %v2532_v41 = vld [vmem:[%s2944_s18 + $0x74] sm:$0xf0]  ;;  %v2080_v8 = vor.u32 %v2567_v5, %v2077_v6  ;;  %v2200_v21 = vor.u32 %v2597_v14, %v2197_v15  ;;  %v2069_v22 = vld [vmem:[%s4010_s1 + $0x88] sm:$0xf0]  ;;  %v1957_v27 = vld [vmem:[%s2944_s18 + $0xb0] sm:$0xf0] }
  0x5b   : > { %1369 = vmatpush.bf16.msra.mxu1 %v2104_v49  ;;  %v3390_v49 = vor.u32 %v2528_v42, %v1933_v43  ;;  %v1963_v28 = vld [vmem:[%s2944_s18 + $0x98] sm:$0xf]  ;;  %v2536_v30 = vld [vmem:[%s2944_s18 + $0x9c] sm:$0xf]  ;;  %v3454_v33 = vor.u32 %v2535_v26, %v1957_v27  ;;  %v2627_v42 = vld [vmem:[%s4010_s1 + $0x274] sm:$0xf] }
  0x5c   : > { %1398 = vmatpush.bf16.msra.mxu2 %v2168_v40  ;;  %v1931_v40 = vld [vmem:[%s2944_s18 + $0x58] sm:$0xf]  ;;  %v2317_v52 = vld [vmem:[%s4010_s1 + $0x278] sm:$0xf0]  ;;  %v2675_v55 = vld [vmem:[%s4010_s1 + $0x3f4] sm:$0xf] }
  0x5d   : > { %1128 = vmatmul.bf16.gmra.mxu0 %v3248_v16  ;;  %1427 = vmatpush.bf16.msra.mxu3 %v2232_v46  ;;  %v3386_v46 = vor.u32 %v2527_v34, %v1925_v35  ;;  %v3388_v47 = vor.u32 %v2532_v41, %v1931_v40  ;;  %v2659_v40 = vld [vmem:[%s4010_s1 + $0x374] sm:$0xf]  ;;  %v2445_v41 = vld [vmem:[%s4010_s1 + $0x378] sm:$0xf0]  ;;  %v1987_v61 = vld [vmem:[%s2944_s18 + $0xd0] sm:$0xf] }
  0x5e   : > { %1157 = vmatmul.bf16.gmra.mxu1 %v3250_v17  ;;  %1341 = vmatpush.bf16.msra.mxu0 %v2032_v11  ;;  %v2005_v11 = vld [vmem:[%s4010_s1 + $0x8] sm:$0xf0]  ;;  %v2448_v43 = vor.u32 %v2659_v40, %v2445_v41  ;;  %v2509_v58 = vld [vmem:[%s4010_s1 + $0x3f8] sm:$0xf0]  ;;  %v2547_v62 = vld [vmem:[%s2944_s18 + $0xec] sm:$0xf0] }
  0x5f   : > { %1186 = vmatmul.bf16.gmra.mxu2 %v3252_v18  ;;  %1370 = vmatpush.bf16.msra.mxu1 %v2096_v20  ;;  %v2008_v13 = vor.u32 %v2549_v10, %v2005_v11  ;;  %v2565_v20 = vld [vmem:[%s4010_s1 + $0x84] sm:$0xf]  ;;  %v2512_v60 = vor.u32 %v2675_v55, %v2509_v58  ;;  %v2543_v10 = vld [vmem:[%s2944_s18 + $0xd4] sm:$0xf]  ;;  %v2501_v14 = vld [vmem:[%s4010_s1 + $0x3e8] sm:$0xf0] }
  0x60   : > { %1215 = vmatmul.bf16.gmra.mxu3 %v3254_v19  ;;  %1399 = vmatpush.bf16.msra.mxu2 %v2160_v7  ;;  %v2581_v7 = vld [vmem:[%s4010_s1 + $0x104] sm:$0xf]  ;;  %v2072_v23 = vor.u32 %v2565_v20, %v2069_v22  ;;  %v1989_v15 = vld [vmem:[%s2944_s18 + $0xf0] sm:$0xf0]  ;;  %v1995_v20 = vld [vmem:[%s2944_s18 + $0xd8] sm:$0xf] }
  0x61   : > { %1428 = vmatpush.bf16.msra.mxu3 %v2224_v12  ;;  %v2136_v12 = vor.u32 %v2581_v7, %v2133_v9  ;;  %v2657_v5 = vld [vmem:[%s4010_s1 + $0x364] sm:$0xf]  ;;  %v2437_v7 = vld [vmem:[%s4010_s1 + $0x368] sm:$0xf0]  ;;  %v3516_v26 = vor.u32 %v2543_v10, %v1989_v15  ;;  %v2655_v40 = vld [vmem:[%s4010_s1 + $0x354] sm:$0xf] }
  0x62   : > { %1342 = vmatpush.bf16.msra.mxu0 %v2024_v25  ;;  %v2539_v25 = vld [vmem:[%s2944_s18 + $0xac] sm:$0xf0]  ;;  %v2309_v9 = vld [vmem:[%s4010_s1 + $0x268] sm:$0xf0]  ;;  %v2440_v11 = vor.u32 %v2657_v5, %v2437_v7  ;;  %v2429_v41 = vld [vmem:[%s4010_s1 + $0x358] sm:$0xf0] }
  0x63   : > { %1371 = vmatpush.bf16.msra.mxu1 %v2088_v31  ;;  %v1965_v31 = vld [vmem:[%s2944_s18 + $0xb8] sm:$0xf0]  ;;  %v2671_v55 = vld [vmem:[%s4010_s1 + $0x3d4] sm:$0xf]  ;;  %v2421_v5 = vld [vmem:[%s4010_s1 + $0x348] sm:$0xf0] }
  0x64   : > { %1400 = vmatpush.bf16.msra.mxu2 %v2152_v24  ;;  %v1955_v24 = vld [vmem:[%s2944_s18 + $0x90] sm:$0xf]  ;;  %v3458_v35 = vor.u32 %v2536_v30, %v1965_v31  ;;  %v2373_v30 = vld [vmem:[%s4010_s1 + $0x2e8] sm:$0xf0]  ;;  %v2493_v58 = vld [vmem:[%s4010_s1 + $0x3d8] sm:$0xf0] }
  0x65   : > { %1429 = vmatpush.bf16.msra.mxu3 %v2216_v29  ;;  %v2540_v29 = vld [vmem:[%s2944_s18 + $0xb4] sm:$0xf0]  ;;  %v3452_v32 = vor.u32 %v2539_v25, %v1955_v24  ;;  %v1997_v24 = vld [vmem:[%s2944_s18 + $0xf8] sm:$0xf0]  ;;  %v3514_v25 = vor.u32 %v2547_v62, %v1987_v61  ;;  %v2639_v61 = vld [vmem:[%s4010_s1 + $0x2d4] sm:$0xf] }
  0x66   : > { %1343 = vmatpush.bf16.msra.mxu0 %v2016_v63  ;;  %v3456_v34 = vor.u32 %v2540_v29, %v1963_v28  ;;  %v2643_v63 = vld [vmem:[%s4010_s1 + $0x2f4] sm:$0xf]  ;;  %v2641_v29 = vld [vmem:[%s4010_s1 + $0x2e4] sm:$0xf]  ;;  %v2365_v62 = vld [vmem:[%s4010_s1 + $0x2d8] sm:$0xf0] }
  0x67   : > { %1372 = vmatpush.bf16.msra.mxu1 %v2080_v8  ;;  %v2625_v8 = vld [vmem:[%s4010_s1 + $0x264] sm:$0xf]  ;;  %v2376_v31 = vor.u32 %v2641_v29, %v2373_v30  ;;  %v2293_v7 = vld [vmem:[%s4010_s1 + $0x248] sm:$0xf0] }
  0x68   : > { %1401 = vmatpush.bf16.msra.mxu2 %v2144_v59  ;;  %v2320_v59 = vor.u32 %v2627_v42, %v2317_v52  ;;  %v2623_v42 = vld [vmem:[%s4010_s1 + $0x254] sm:$0xf]  ;;  %v2301_v52 = vld [vmem:[%s4010_s1 + $0x258] sm:$0xf0]  ;;  %v2669_v10 = vld [vmem:[%s4010_s1 + $0x3c4] sm:$0xf] }
  0x69   : > { %1430 = vmatpush.bf16.msra.mxu3 %v2208_v4  ;;  %v2381_v4 = vld [vmem:[%s4010_s1 + $0x2f8] sm:$0xf0] }
  0x6a   : > { %1344 = vmatpush.bf16.msra.mxu0 %v2008_v13  ;;  %v2384_v6 = vor.u32 %v2643_v63, %v2381_v4  ;;  %v2673_v13 = vld [vmem:[%s4010_s1 + $0x3e4] sm:$0xf]  ;;  %v2368_v4 = vor.u32 %v2639_v61, %v2365_v62 }
  0x6b   : > { %1373 = vmatpush.bf16.msra.mxu1 %v2072_v23  ;;  %v2504_v22 = vor.u32 %v2673_v13, %v2501_v14  ;;  %v2544_v23 = vld [vmem:[%s2944_s18 + $0xdc] sm:$0xf]  ;;  %v2653_v63 = vld [vmem:[%s4010_s1 + $0x344] sm:$0xf] }
  0x6c   : > { %1402 = vmatpush.bf16.msra.mxu2 %v2136_v12  ;;  %v2312_v12 = vor.u32 %v2625_v8, %v2309_v9  ;;  %v3520_v28 = vor.u32 %v2544_v23, %v1997_v24  ;;  %v2424_v8 = vor.u32 %v2653_v63, %v2421_v5  ;;  %v2651_v23 = vld [vmem:[%s4010_s1 + $0x334] sm:$0xf]  ;;  %v2413_v24 = vld [vmem:[%s4010_s1 + $0x338] sm:$0xf0]  ;;  %v2649_v61 = vld [vmem:[%s4010_s1 + $0x324] sm:$0xf] }
  0x6d   : > { %1229 = vmatmul.bf16.vlgmr.msrb.gmra.mxu0 %v3316_v0  ;;  %1431 = vmatpush.bf16.msra.mxu3 %v2200_v21  ;;  %v2548_v21 = vld [vmem:[%s2944_s18 + $0xf4] sm:$0xf0]  ;;  %v2416_v29 = vor.u32 %v2651_v23, %v2413_v24  ;;  %v2405_v63 = vld [vmem:[%s4010_s1 + $0x328] sm:$0xf0] }
  0x6e   : > { %1258 = vmatmul.bf16.vlgmr.msrb.gmra.mxu1 %v3318_v1  ;;  %1453 = vmatpush.bf16.msrb.mxu0 %v2320_v59  ;;  %v3518_v27 = vor.u32 %v2548_v21, %v1995_v20  ;;  %v2304_v59 = vor.u32 %v2623_v42, %v2301_v52  ;;  %v2637_v20 = vld [vmem:[%s4010_s1 + $0x2c4] sm:$0xf]  ;;  %v2357_v21 = vld [vmem:[%s4010_s1 + $0x2c8] sm:$0xf0] }
  0x6f   : > { %1287 = vmatmul.bf16.vlgmr.msrb.gmra.mxu2 %v3320_v2  ;;  %1482 = vmatpush.bf16.msrb.mxu1 %v2384_v6  ;;  %v2621_v6 = vld [vmem:[%s4010_s1 + $0x244] sm:$0xf]  ;;  %v2277_v5 = vld [vmem:[%s4010_s1 + $0x228] sm:$0xf0] }
  0x70   : > { %1316 = vmatmul.bf16.vlgmr.msrb.gmra.mxu3 %v3322_v3  ;;  %1511 = vmatpush.bf16.msrb.mxu2 %v2448_v43  ;;  %v2432_v43 = vor.u32 %v2655_v40, %v2429_v41  ;;  %v2296_v9 = vor.u32 %v2621_v6, %v2293_v7  ;;  %v2408_v6 = vor.u32 %v2649_v61, %v2405_v63  ;;  %v2341_v23 = vld [vmem:[%s4010_s1 + $0x2a8] sm:$0xf0]  ;;  %v2613_v63 = vld [vmem:[%s4010_s1 + $0x204] sm:$0xf] }
  0x71   : > { %1540 = vmatpush.bf16.msrb.mxu3 %v2512_v60  ;;  %v2496_v60 = vor.u32 %v2671_v55, %v2493_v58 }
  0x72   : > { %1454 = vmatpush.bf16.msrb.mxu0 %v2312_v12 }
  0x73   : > { %1483 = vmatpush.bf16.msrb.mxu1 %v2376_v31 }
  0x74   : > { %1512 = vmatpush.bf16.msrb.mxu2 %v2440_v11  ;;  %v2485_v11 = vld [vmem:[%s4010_s1 + $0x3c8] sm:$0xf0] }
  0x75   : > { %1541 = vmatpush.bf16.msrb.mxu3 %v2504_v22  ;;  %v2488_v12 = vor.u32 %v2669_v10, %v2485_v11  ;;  %v2360_v22 = vor.u32 %v2637_v20, %v2357_v21 }
  0x76   : > { %1455 = vmatpush.bf16.msrb.mxu0 %v2304_v59  ;;  %v2635_v59 = vld [vmem:[%s4010_s1 + $0x2b4] sm:$0xf] }
  0x77   : > { %1484 = vmatpush.bf16.msrb.mxu1 %v2368_v4  ;;  %v2617_v4 = vld [vmem:[%s4010_s1 + $0x224] sm:$0xf] }
  0x78   : > { %1513 = vmatpush.bf16.msrb.mxu2 %v2432_v43  ;;  %v2280_v7 = vor.u32 %v2617_v4, %v2277_v5  ;;  %v2261_v4 = vld [vmem:[%s4010_s1 + $0x208] sm:$0xf0] }
  0x79   : > { %1542 = vmatpush.bf16.msrb.mxu3 %v2496_v60  ;;  %v2349_v60 = vld [vmem:[%s4010_s1 + $0x2b8] sm:$0xf0] }
  0x7a   : > { %1456 = vmatpush.bf16.msrb.mxu0 %v2296_v9  ;;  %v2352_v62 = vor.u32 %v2635_v59, %v2349_v60  ;;  %v2469_v9 = vld [vmem:[%s4010_s1 + $0x3a8] sm:$0xf0]  ;;  %v2333_v59 = vld [vmem:[%s4010_s1 + $0x298] sm:$0xf0]  ;;  %v2645_v60 = vld [vmem:[%s4010_s1 + $0x304] sm:$0xf] }
  0x7b   : > { %1485 = vmatpush.bf16.msrb.mxu1 %v2360_v22  ;;  %v2633_v22 = vld [vmem:[%s4010_s1 + $0x2a4] sm:$0xf] }
  0x7c   : > { %1514 = vmatpush.bf16.msrb.mxu2 %v2424_v8  ;;  %v2665_v8 = vld [vmem:[%s4010_s1 + $0x3a4] sm:$0xf]  ;;  %v2344_v24 = vor.u32 %v2633_v22, %v2341_v23 }
  0x7d   : > { %1234 = vmatmul.bf16.gmra.mxu0 %v3384_v45  ;;  %1543 = vmatpush.bf16.msrb.mxu3 %v2488_v12  ;;  %v2472_v10 = vor.u32 %v2665_v8, %v2469_v9  ;;  %v2453_v8 = vld [vmem:[%s4010_s1 + $0x388] sm:$0xf0] }
  0x7e   : > { %1263 = vmatmul.bf16.gmra.mxu1 %v3386_v46 }
  0x7f   : > { %1292 = vmatmul.bf16.gmra.mxu2 %v3388_v47  ;;  %1486 = vmatpush.bf16.msrb.mxu1 %v2352_v62  ;;  %v2389_v62 = vld [vmem:[%s4010_s1 + $0x308] sm:$0xf0] }
  0x80   : > { %1321 = vmatmul.bf16.gmra.mxu3 %v3390_v49  ;;  %1515 = vmatpush.bf16.msrb.mxu2 %v2416_v29  ;;  %v2397_v29 = vld [vmem:[%s4010_s1 + $0x318] sm:$0xf0]  ;;  %v2392_v5 = vor.u32 %v2645_v60, %v2389_v62 }
  0x83   : > { %1487 = vmatpush.bf16.msrb.mxu1 %v2344_v24 }
  0x84   : > { %1516 = vmatpush.bf16.msrb.mxu2 %v2408_v6  ;;  %v2264_v6 = vor.u32 %v2613_v63, %v2261_v4 }
  0x8d   : > { %1239 = vmatmul.bf16.gmra.mxu0 %v3452_v32 }
  0x8e   : > { %1268 = vmatmul.bf16.gmra.mxu1 %v3454_v33 }
  0x8f   : > { %1297 = vmatmul.bf16.gmra.mxu2 %v3456_v34 }
  0x90   : > { %1326 = vmatmul.bf16.gmra.mxu3 %v3458_v35 }
  0x9d   : > { %1244 = vmatmul.bf16.gmra.mxu0 %v3514_v25 }
  0x9e   : > { %1273 = vmatmul.bf16.gmra.mxu1 %v3516_v26 }
  0x9f   : > { %1302 = vmatmul.bf16.gmra.mxu2 %v3518_v27 }
  0xa0   : > { %1331 = vmatmul.bf16.gmra.mxu3 %v3520_v28 }
  0xaa   : > { %v1114_v13 = vpop.f32.mrf.mxu0 }
  0xab   : > { %v1143_v14 = vpop.f32.mrf.mxu1 }
  0xac   : > { %v1144_v15 = vadd.f32 %v1143_v14, %v1114_v13 }
  0xad   : > { %1345 = vmatmul.bf16.vlgmr.msra.gmra.mxu0 %v2973_v48  ;;  %v2619_v48 = vld [vmem:[%s4010_s1 + $0x234] sm:$0xf] }
  0xae   : > { %1374 = vmatmul.bf16.vlgmr.msra.gmra.mxu1 %v2980_v53  ;;  %v2285_v53 = vld [vmem:[%s4010_s1 + $0x238] sm:$0xf0] }
  0xaf   : > { %1403 = vmatmul.bf16.vlgmr.msra.gmra.mxu2 %v2982_v54  ;;  %v2667_v54 = vld [vmem:[%s4010_s1 + $0x3b4] sm:$0xf]  ;;  %v2288_v31 = vor.u32 %v2619_v48, %v2285_v53 }
  0xb0   : > { %1432 = vmatmul.bf16.vlgmr.msra.gmra.mxu3 %v2990_v57  ;;  %v2477_v57 = vld [vmem:[%s4010_s1 + $0x3b8] sm:$0xf0]  ;;  %v2647_v48 = vld [vmem:[%s4010_s1 + $0x314] sm:$0xf] }
  0xb1   : > { %v2480_v40 = vor.u32 %v2667_v54, %v2477_v57  ;;  %1457 = vmatpush.bf16.msrb.mxu0 %v2288_v31  ;;  %v2400_v53 = vor.u32 %v2647_v48, %v2397_v29 }
  0xb2   : > { %v1172_v30 = vpop.f32.mrf.mxu2  ;;  %v1116_v43 = vpop.f32.mrf.mxu0 }
  0xb3   : > { %v1173_v41 = vadd.f32 %v1172_v30, %v1144_v15  ;;  %v1201_v42 = vpop.f32.mrf.mxu3  ;;  %v1145_v52 = vpop.f32.mrf.mxu1  ;;  %1544 = vmatpush.bf16.msrb.mxu3 %v2480_v40  ;;  %1517 = vmatpush.bf16.msrb.mxu2 %v2400_v53 }
  0xb4   : > { %v1146_v58 = vadd.f32 %v1145_v52, %v1116_v43 }
  0xb5   : > { %v3602_v55 = vadd.f32 %v1201_v42, %v1173_v41  ;;  %1458 = vmatpush.bf16.msrb.mxu0 %v2280_v7  ;;  %v2661_v7 = vld [vmem:[%s4010_s1 + $0x384] sm:$0xf] }
  0xb6   : > { %v2456_v9 = vor.u32 %v2661_v7, %v2453_v8 }
  0xb7   : > { %1545 = vmatpush.bf16.msrb.mxu3 %v2472_v10  ;;  %1518 = vmatpush.bf16.msrb.mxu2 %v2392_v5 }
  0xba   : > { %v1174_v11 = vpop.f32.mrf.mxu2  ;;  %v1119_v14 = vpop.f32.mrf.mxu0 }
  0xbb   : > { %v1175_v12 = vadd.f32 %v1174_v11, %v1146_v58  ;;  %v1203_v13 = vpop.f32.mrf.mxu3  ;;  %v1148_v15 = vpop.f32.mrf.mxu1  ;;  %v2631_v58 = vld [vmem:[%s4010_s1 + $0x294] sm:$0xf]  ;;  %v2629_v11 = vld [vmem:[%s4010_s1 + $0x284] sm:$0xf] }
  0xbc   : > { %v1149_v21 = vadd.f32 %v1148_v15, %v1119_v14  ;;  %v2336_v61 = vor.u32 %v2631_v58, %v2333_v59 }
  0xbd   : > { %v3628_v20 = vadd.f32 %v1203_v13, %v1175_v12  ;;  %1350 = vmatmul.bf16.gmra.mxu0 %v3085_v44  ;;  %v2615_v44 = vld [vmem:[%s4010_s1 + $0x214] sm:$0xf]  ;;  %v2325_v12 = vld [vmem:[%s4010_s1 + $0x288] sm:$0xf0] }
  0xbe   : > { %1379 = vmatmul.bf16.gmra.mxu1 %v3096_v50  ;;  %v2269_v50 = vld [vmem:[%s4010_s1 + $0x218] sm:$0xf0] }
  0xbf   : > { %1408 = vmatmul.bf16.gmra.mxu2 %v3098_v51  ;;  %v2663_v51 = vld [vmem:[%s4010_s1 + $0x394] sm:$0xf]  ;;  %v2272_v57 = vor.u32 %v2615_v44, %v2269_v50  ;;  %1488 = vmatpush.bf16.msrb.mxu1 %v2336_v61 }
  0xc0   : > { %1437 = vmatmul.bf16.gmra.mxu3 %v3106_v56  ;;  %v2461_v56 = vld [vmem:[%s4010_s1 + $0x398] sm:$0xf0] }
  0xc1   : > { %v2464_v30 = vor.u32 %v2663_v51, %v2461_v56  ;;  %1459 = vmatpush.bf16.msrb.mxu0 %v2272_v57 }
  0xc2   : > { %v1177_v54 = vpop.f32.mrf.mxu2  ;;  %v1121_v41 = vpop.f32.mrf.mxu0 }
  0xc3   : > { %v1178_v31 = vadd.f32 %v1177_v54, %v1149_v21  ;;  %v1206_v40 = vpop.f32.mrf.mxu3  ;;  %v1150_v42 = vpop.f32.mrf.mxu1  ;;  %1546 = vmatpush.bf16.msrb.mxu3 %v2464_v30  ;;  %v2328_v21 = vor.u32 %v2629_v11, %v2325_v12 }
  0xc4   : > { %v1151_v52 = vadd.f32 %v1150_v42, %v1121_v41 }
  0xc5   : > { %v3658_v43 = vadd.f32 %v1206_v40, %v1178_v31  ;;  %1460 = vmatpush.bf16.msrb.mxu0 %v2264_v6  ;;  %1489 = vmatpush.bf16.msrb.mxu1 %v2328_v21 }
  0xc7   : > { %1547 = vmatpush.bf16.msrb.mxu3 %v2456_v9 }
  0xca   : > { %v1179_v10 = vpop.f32.mrf.mxu2  ;;  %v1124_v15 = vpop.f32.mrf.mxu0 }
  0xcb   : > { %v1180_v13 = vadd.f32 %v1179_v10, %v1151_v52  ;;  %v1208_v14 = vpop.f32.mrf.mxu3  ;;  %v1153_v22 = vpop.f32.mrf.mxu1 }
  0xcc   : > { %v1154_v24 = vadd.f32 %v1153_v22, %v1124_v15 }
  0xcd   : > { %v3690_v23 = vadd.f32 %v1208_v14, %v1180_v13  ;;  %1355 = vmatmul.bf16.gmra.mxu0 %v3180_v36 }
  0xce   : > { %1384 = vmatmul.bf16.gmra.mxu1 %v3182_v37 }
  0xcf   : > { %1413 = vmatmul.bf16.gmra.mxu2 %v3184_v38 }
  0xd0   : > { %1442 = vmatmul.bf16.gmra.mxu3 %v3186_v39 }
  0xd2   : > { %v1182_v48 = vpop.f32.mrf.mxu2  ;;  %v1126_v53 = vpop.f32.mrf.mxu0 }
  0xd3   : > { %v1183_v29 = vadd.f32 %v1182_v48, %v1154_v24  ;;  %v1211_v44 = vpop.f32.mrf.mxu3  ;;  %v1155_v50 = vpop.f32.mrf.mxu1 }
  0xd4   : > { %v1156_v56 = vadd.f32 %v1155_v50, %v1126_v53 }
  0xd5   : > { %v3696_v51 = vadd.f32 %v1211_v44, %v1183_v29 }
  0xda   : > { %v1184_v54 = vpop.f32.mrf.mxu2  ;;  %v1129_v31 = vpop.f32.mrf.mxu0 }
  0xdb   : > { %v1185_v57 = vadd.f32 %v1184_v54, %v1156_v56  ;;  %v1213_v30 = vpop.f32.mrf.mxu3  ;;  %v1158_v40 = vpop.f32.mrf.mxu1 }
  0xdc   : > { %v1159_v37 = vadd.f32 %v1158_v40, %v1129_v31 }
  0xdd   : > { %v3698_v36 = vadd.f32 %v1213_v30, %v1185_v57  ;;  %1360 = vmatmul.bf16.gmra.mxu0 %v3248_v16 }
  0xde   : > { %1389 = vmatmul.bf16.gmra.mxu1 %v3250_v17 }
  0xdf   : > { %1418 = vmatmul.bf16.gmra.mxu2 %v3252_v18 }
  0xe0   : > { %1447 = vmatmul.bf16.gmra.mxu3 %v3254_v19 }
  0xe2   : > { %v1187_v38 = vpop.f32.mrf.mxu2  ;;  %v1131_v42 = vpop.f32.mrf.mxu0 }
  0xe3   : > { %v1188_v39 = vadd.f32 %v1187_v38, %v1159_v37  ;;  %v1216_v41 = vpop.f32.mrf.mxu3  ;;  %v1160_v52 = vpop.f32.mrf.mxu1 }
  0xe4   : > { %v1161_v59 = vadd.f32 %v1160_v52, %v1131_v42 }
  0xe5   : > { %v3704_v58 = vadd.f32 %v1216_v41, %v1188_v39 }
  0xea   : > { %v1189_v60 = vpop.f32.mrf.mxu2  ;;  %v1230_v63 = vpop.f32.mrf.mxu0 }
  0xeb   : > { %v1190_v61 = vadd.f32 %v1189_v60, %v1161_v59  ;;  %v1218_v62 = vpop.f32.mrf.mxu3  ;;  %v1231_v16 = vadd.f32 %v1230_v63, %v3602_v55  ;;  %v1259_v4 = vpop.f32.mrf.mxu1 }
  0xed   : > { %v3707_v17 = vadd.f32 %v1218_v62, %v1190_v61  ;;  %v1260_v18 = vadd.f32 %v1259_v4, %v1231_v16  ;;  %1461 = vmatmul.bf16.vlgmr.msrb.gmra.mxu0 %v3316_v0 }
  0xee   : > { %1490 = vmatmul.bf16.vlgmr.msrb.gmra.mxu1 %v3318_v1 }
  0xef   : > { %1519 = vmatmul.bf16.vlgmr.msrb.gmra.mxu2 %v3320_v2 }
  0xf0   : > { %1548 = vmatmul.bf16.vlgmr.msrb.gmra.mxu3 %v3322_v3 }
  0xf2   : > { %v1288_v19 = vpop.f32.mrf.mxu2  ;;  %v1232_v7 = vpop.f32.mrf.mxu0 }
  0xf3   : > { %v1289_v5 = vadd.f32 %v1288_v19, %v1260_v18  ;;  %v1317_v6 = vpop.f32.mrf.mxu3  ;;  %v1233_v8 = vadd.f32 %v1232_v7, %v3628_v20  ;;  %v1261_v9 = vpop.f32.mrf.mxu1 }
  0xf5   : > { %v3714_v55 = vadd.f32 %v1317_v6, %v1289_v5  ;;  %v1262_v10 = vadd.f32 %v1261_v9, %v1233_v8 }
  0xfa   : > { %v1290_v11 = vpop.f32.mrf.mxu2  ;;  %v1235_v0 = vpop.f32.mrf.mxu0 }
  0xfb   : > { %v1291_v12 = vadd.f32 %v1290_v11, %v1262_v10  ;;  %v1319_v13 = vpop.f32.mrf.mxu3  ;;  %v1236_v1 = vadd.f32 %v1235_v0, %v3658_v43  ;;  %v1264_v14 = vpop.f32.mrf.mxu1 }
  0xfd   : > { %v3717_v2 = vadd.f32 %v1319_v13, %v1291_v12  ;;  %v1265_v3 = vadd.f32 %v1264_v14, %v1236_v1  ;;  %1466 = vmatmul.bf16.gmra.mxu0 %v3384_v45 }
  0xfe   : > { %1495 = vmatmul.bf16.gmra.mxu1 %v3386_v46 }
  0xff   : > { %1524 = vmatmul.bf16.gmra.mxu2 %v3388_v47 }
 0x100   : > { %1553 = vmatmul.bf16.gmra.mxu3 %v3390_v49 }
 0x102   : > { %v1293_v20 = vpop.f32.mrf.mxu2  ;;  %v1237_v22 = vpop.f32.mrf.mxu0 }
 0x103   : > { %v1294_v15 = vadd.f32 %v1293_v20, %v1265_v3  ;;  %v1322_v21 = vpop.f32.mrf.mxu3  ;;  %v1238_v24 = vadd.f32 %v1237_v22, %v3690_v23  ;;  %v1266_v48 = vpop.f32.mrf.mxu1 }
 0x105   : > { %v3724_v43 = vadd.f32 %v1322_v21, %v1294_v15  ;;  %v1267_v29 = vadd.f32 %v1266_v48, %v1238_v24 }
 0x10a   : > { %v1295_v44 = vpop.f32.mrf.mxu2  ;;  %v1240_v45 = vpop.f32.mrf.mxu0 }
 0x10b   : > { %v1296_v53 = vadd.f32 %v1295_v44, %v1267_v29  ;;  %v1324_v50 = vpop.f32.mrf.mxu3  ;;  %v1241_v46 = vadd.f32 %v1240_v45, %v3696_v51  ;;  %v1269_v56 = vpop.f32.mrf.mxu1 }
 0x10d   : > { %v3727_v47 = vadd.f32 %v1324_v50, %v1296_v53  ;;  %v1270_v49 = vadd.f32 %v1269_v56, %v1241_v46  ;;  %1471 = vmatmul.bf16.gmra.mxu0 %v3452_v32 }
 0x10e   : > { %1500 = vmatmul.bf16.gmra.mxu1 %v3454_v33 }
 0x10f   : > { %1529 = vmatmul.bf16.gmra.mxu2 %v3456_v34 }
 0x110   : > { %1558 = vmatmul.bf16.gmra.mxu3 %v3458_v35 }
 0x112   : > { %v1298_v23 = vpop.f32.mrf.mxu2  ;;  %v1242_v30 = vpop.f32.mrf.mxu0 }
 0x113   : > { %v1299_v54 = vadd.f32 %v1298_v23, %v1270_v49  ;;  %v1327_v57 = vpop.f32.mrf.mxu3  ;;  %v1243_v31 = vadd.f32 %v1242_v30, %v3698_v36  ;;  %v1271_v40 = vpop.f32.mrf.mxu1 }
 0x115   : > { %v3734_v51 = vadd.f32 %v1327_v57, %v1299_v54  ;;  %v1272_v37 = vadd.f32 %v1271_v40, %v1243_v31 }
 0x117   : > { %v3738_v38 = vadd.f32 %v3734_v51, %v3714_v55 }
 0x11a   : > { %v1300_v32 = vpop.f32.mrf.mxu2  ;;  %v1245_v34 = vpop.f32.mrf.mxu0 }
 0x11b   : > { %v1301_v33 = vadd.f32 %v1300_v32, %v1272_v37  ;;  %v1329_v39 = vpop.f32.mrf.mxu3  ;;  %v1246_v35 = vadd.f32 %v1245_v34, %v3704_v58  ;;  %v1274_v41 = vpop.f32.mrf.mxu1 }
 0x11d   : > { %v3741_v42 = vadd.f32 %v1329_v39, %v1301_v33  ;;  %v1275_v52 = vadd.f32 %v1274_v41, %v1246_v35  ;;  %1476 = vmatmul.bf16.gmra.mxu0 %v3514_v25 }
 0x11e   : > { %1505 = vmatmul.bf16.gmra.mxu1 %v3516_v26 }
 0x11f   : > { %v3746_v36 = vadd.f32 %v3741_v42, %v3717_v2  ;;  %1534 = vmatmul.bf16.gmra.mxu2 %v3518_v27 }
 0x120   : > { %1563 = vmatmul.bf16.gmra.mxu3 %v3520_v28 }
 0x122   : > { %v1303_v59 = vpop.f32.mrf.mxu2  ;;  %v1247_v58 = vpop.f32.mrf.mxu0 }
 0x123   : > { %v1304_v60 = vadd.f32 %v1303_v59, %v1275_v52  ;;  %v1332_v61 = vpop.f32.mrf.mxu3  ;;  %v1248_v62 = vadd.f32 %v1247_v58, %v3707_v17  ;;  %v1276_v63 = vpop.f32.mrf.mxu1 }
 0x125   : > { %v3752_v16 = vadd.f32 %v1332_v61, %v1304_v60  ;;  %v1277_v25 = vadd.f32 %v1276_v63, %v1248_v62 }
 0x127   : > { %v3756_v4 = vadd.f32 %v3752_v16, %v3724_v43 }
 0x12a   : > { %v1305_v18 = vpop.f32.mrf.mxu2  ;;  %v1346_v27 = vpop.f32.mrf.mxu0 }
 0x12b   : > { %v1306_v26 = vadd.f32 %v1305_v18, %v1277_v25  ;;  %v1334_v19 = vpop.f32.mrf.mxu3  ;;  %v1375_v5 = vpop.f32.mrf.mxu1 }
 0x12c   : > { %v1376_v6 = vadd.f32 %v1375_v5, %v1346_v27 }
 0x12d   : > { %v3758_v28 = vadd.f32 %v1334_v19, %v1306_v26 }
 0x12f   : > { %v3762_v7 = vadd.f32 %v3758_v28, %v3727_v47 }
 0x132   : > { %v1404_v17 = vpop.f32.mrf.mxu2  ;;  %v1348_v10 = vpop.f32.mrf.mxu0 }
 0x133   : > { %v1405_v8 = vadd.f32 %v1404_v17, %v1376_v6  ;;  %v1433_v9 = vpop.f32.mrf.mxu3  ;;  %v1377_v11 = vpop.f32.mrf.mxu1 }
 0x134   : > { %v1378_v13 = vadd.f32 %v1377_v11, %v1348_v10 }
 0x135   : > { %v1434_v12 = vadd.f32 %v1433_v9, %v1405_v8 }
 0x13a   : > { %v1406_v0 = vpop.f32.mrf.mxu2  ;;  %v1351_v3 = vpop.f32.mrf.mxu0 }
 0x13b   : > { %v1407_v1 = vadd.f32 %v1406_v0, %v1378_v13  ;;  %v1435_v14 = vpop.f32.mrf.mxu3  ;;  %v1380_v20 = vpop.f32.mrf.mxu1  ;;  %v1569_v0 = vmul.f32 %v3714_v55, %v3714_v55 }
 0x13c   : > { %v1381_v21 = vadd.f32 %v1380_v20, %v1351_v3 }
 0x13d   : > { %v1436_v15 = vadd.f32 %v1435_v14, %v1407_v1 }
 0x142   : > { %v1409_v22 = vpop.f32.mrf.mxu2  ;;  %v1353_v29 = vpop.f32.mrf.mxu0 }
 0x143   : > { %v1410_v24 = vadd.f32 %v1409_v22, %v1381_v21  ;;  %v1438_v48 = vpop.f32.mrf.mxu3  ;;  %v1382_v44 = vpop.f32.mrf.mxu1 }
 0x144   : > { %v1383_v50 = vadd.f32 %v1382_v44, %v1353_v29 }
 0x145   : > { %v1439_v53 = vadd.f32 %v1438_v48, %v1410_v24 }
 0x14a   : > { %v1411_v45 = vpop.f32.mrf.mxu2  ;;  %v1356_v49 = vpop.f32.mrf.mxu0 }
 0x14b   : > { %v1412_v46 = vadd.f32 %v1411_v45, %v1383_v50  ;;  %v1440_v56 = vpop.f32.mrf.mxu3  ;;  %v1385_v23 = vpop.f32.mrf.mxu1 }
 0x14c   : > { %v1386_v57 = vadd.f32 %v1385_v23, %v1356_v49 }
 0x14d   : > { %v1441_v54 = vadd.f32 %v1440_v56, %v1412_v46 }
 0x152   : > { %v1414_v30 = vpop.f32.mrf.mxu2  ;;  %v1358_v37 = vpop.f32.mrf.mxu0 }
 0x153   : > { %v1415_v31 = vadd.f32 %v1414_v30, %v1386_v57  ;;  %v1443_v40 = vpop.f32.mrf.mxu3  ;;  %v1387_v32 = vpop.f32.mrf.mxu1 }
 0x154   : > { %v1388_v39 = vadd.f32 %v1387_v32, %v1358_v37 }
 0x155   : > { %v3764_v33 = vadd.f32 %v1443_v40, %v1415_v31  ;;  %v1571_v31 = vmul.f32 %v3724_v43, %v3724_v43 }
 0x15a   : > { %v1416_v34 = vpop.f32.mrf.mxu2  ;;  %v3766_v52 = vpop.f32.mrf.mxu0 }
 0x15b   : > { %v1417_v35 = vadd.f32 %v1416_v34, %v1388_v39  ;;  %v1445_v41 = vpop.f32.mrf.mxu3  ;;  %v3768_v59 = vpop.f32.mrf.mxu1 }
 0x15d   : > { %v3770_v60 = vadd.f32 %v1445_v41, %v1417_v35 }
 0x162   : > { %v3772_v61 = vpop.f32.mrf.mxu2  ;;  %v3776_v62 = vpop.f32.mrf.mxu0 }
 0x163   : > { %v3774_v58 = vpop.f32.mrf.mxu3  ;;  %v3778_v63 = vpop.f32.mrf.mxu1 }
 0x16a   : > { %v3780_v25 = vpop.f32.mrf.mxu2  ;;  %v1462_v26 = vpop.f32.mrf.mxu0 }
 0x16b   : > { %v3782_v18 = vpop.f32.mrf.mxu3  ;;  %v1491_v19 = vpop.f32.mrf.mxu1  ;;  %v1463_v27 = vadd.f32 %v1462_v26, %v1434_v12 }
 0x16d   : > { %v1492_v5 = vadd.f32 %v1491_v19, %v1463_v27 }
 0x172   : > { %v1520_v6 = vpop.f32.mrf.mxu2  ;;  %v1464_v9 = vpop.f32.mrf.mxu0 }
 0x173   : > { %v1521_v17 = vadd.f32 %v1520_v6, %v1492_v5  ;;  %v1549_v8 = vpop.f32.mrf.mxu3  ;;  %v1493_v10 = vpop.f32.mrf.mxu1  ;;  %v1465_v13 = vadd.f32 %v1464_v9, %v1436_v15  ;;  %v1570_v15 = vmul.f32 %v3717_v2, %v3717_v2  ;;  %v1572_v6 = vmul.f32 %v3727_v47, %v3727_v47 }
 0x174   : > { %v1391_v47 = vadd.f32 %v3768_v59, %v3766_v52 }
 0x175   : > { %v3784_v11 = vadd.f32 %v1549_v8, %v1521_v17  ;;  %v1494_v3 = vadd.f32 %v1493_v10, %v1465_v13 }
 0x177   : > { %v1573_v1 = vmul.f32 %v3784_v11, %v3784_v11 }
 0x179   : > { %v1577_v14 = vadd.f32 %v1573_v1, %v1569_v0 }
 0x17a   : > { %v1522_v20 = vpop.f32.mrf.mxu2  ;;  %v1467_v22 = vpop.f32.mrf.mxu0 }
 0x17b   : > { %v1523_v21 = vadd.f32 %v1522_v20, %v1494_v3  ;;  %v1551_v12 = vpop.f32.mrf.mxu3  ;;  %v1496_v24 = vpop.f32.mrf.mxu1  ;;  %v1468_v48 = vadd.f32 %v1467_v22, %v1439_v53  ;;  %v3792_v44 = vmax.f32 %v1577_v14, 1e-08 }
 0x17d   : > { %v3790_v29 = vadd.f32 %v1551_v12, %v1523_v21  ;;  %v1497_v50 = vadd.f32 %v1496_v24, %v1468_v48  ;;  %2685 = vrsqrt.f32 %v3792_v44  ;;  %v1633_v48 = vmul.f32 %v3734_v51, %v3734_v51 }
 0x17e   : > { %vm1592_vm0 = vcmp.eq.f32.partialorder %v3792_v44, inf  ;;  %vm1594_vm1 = vcmp.eq.f32.partialorder %v3792_v44, 0.0 }
 0x17f   : > { %v1574_v55 = vmul.f32 %v3790_v29, %v3790_v29 }
 0x181   : > { %v1578_v45 = vadd.f32 %v1574_v55, %v1570_v15  ;;  %v1420_v15 = vadd.f32 %v3772_v61, %v1391_v47 }
 0x182   : > { %v1525_v46 = vpop.f32.mrf.mxu2  ;;  %v1469_v23 = vpop.f32.mrf.mxu0 }
 0x183   : > { %v1526_v56 = vadd.f32 %v1525_v46, %v1497_v50  ;;  %v1554_v49 = vpop.f32.mrf.mxu3  ;;  %v1498_v57 = vpop.f32.mrf.mxu1  ;;  %v1470_v30 = vadd.f32 %v1469_v23, %v1441_v54  ;;  %v3803_v40 = vmax.f32 %v1578_v45, 1e-08  ;;  %v1705_v45 = vmul.f32 %v3738_v38, %v3738_v38 }
 0x184   : > { %v2686_v37 = vpop.eup %2685  ;;  %v1449_v51 = vadd.f32 %v3774_v58, %v1420_v15  ;;  %v1393_v38 = vadd.f32 %v3778_v63, %v3776_v62  ;;  %v1706_v62 = vmul.f32 %v3746_v36, %v3746_v36  ;;  %v1635_v63 = vmul.f32 %v3752_v16, %v3752_v16 }
 0x185   : > { %v3799_v53 = vadd.f32 %v1554_v49, %v1526_v56  ;;  %v1499_v39 = vadd.f32 %v1498_v57, %v1470_v30  ;;  %2687 = vrsqrt.f32 %v3803_v40  ;;  %v1586_v19 = vmul.f32 %v2686_v37, %v3792_v44 }
 0x186   : > { %v3867_v16 = vmul.f32 %v3762_v7, %v3762_v7  ;;  %vm1604_vm2 = vcmp.eq.f32.partialorder %v3803_v40, inf  ;;  %v1607_v15 = vand.u32 2147483648, %v3803_v40  ;;  %vm1606_vm3 = vcmp.eq.f32.partialorder %v3803_v40, 0.0 }
 0x187   : > { %v1575_v2 = vmul.f32 %v3799_v53, %v3799_v53  ;;  %v1587_v17 = vmul.f32 %v2686_v37, %v1586_v19  ;;  %v1634_v19 = vmul.f32 %v3741_v42, %v3741_v42 }
 0x189   : > { %v1579_v32 = vadd.f32 %v1575_v2, %v1571_v31 }
 0x18a   : > { %v1527_v34 = vpop.f32.mrf.mxu2  ;;  %v1472_v26 = vpop.f32.mrf.mxu0 }
 0x18b   : > { %v1528_v35 = vadd.f32 %v1527_v34, %v1499_v39  ;;  %v1556_v41 = vpop.f32.mrf.mxu3  ;;  %v3809_v54 = vmax.f32 %v1579_v32, 1e-08  ;;  %v1501_v27 = vpop.f32.mrf.mxu1  ;;  %v1473_v43 = vadd.f32 %v1472_v26, %v3764_v33  ;;  %v1588_v33 = vmul.f32 0.5, %v1587_v17 }
 0x18c   : > { %v3819_v9 = vpop.eup %2687 }
 0x18d   : > { %v3812_v5 = vadd.f32 %v1556_v41, %v1528_v35  ;;  %2689 = vrsqrt.f32 %v3809_v54  ;;  %v1502_v10 = vadd.f32 %v1501_v27, %v1473_v43  ;;  %v1598_v20 = vmul.f32 %v3819_v9, %v3803_v40 }
 0x18e   : > { %v1589_v46 = vsub.f32 1.5, %v1588_v33  ;;  %v1422_v35 = vadd.f32 %v3780_v25, %v1393_v38  ;;  %v3861_v25 = vmul.f32 %v3758_v28, %v3758_v28  ;;  %v3900_v38 = vstv %s2513_s20 }
 0x18f   : > { %v1576_v8 = vmul.f32 %v3812_v5, %v3812_v5  ;;  %v1599_v52 = vmul.f32 %v3819_v9, %v1598_v20  ;;  %vm1616_vm4 = vcmp.eq.f32.partialorder %v3809_v54, inf  ;;  %vm1618_vm9 = vcmp.eq.f32.partialorder %v3809_v54, 0.0 }
 0x190   : > { %v1590_v32 = vmul.f32 %v2686_v37, %v1589_v46  ;;  %v3857_v37 = vmul.f32 %v3756_v4, %v3756_v4  ;;  %v1451_v4 = vadd.f32 %v3782_v18, %v1422_v35 }
 0x191   : > { %v1580_v13 = vadd.f32 %v1576_v8, %v1572_v6  ;;  %v1600_v2 = vmul.f32 0.5, %v1599_v52 }
 0x192   : > { %v1530_v0 = vpop.f32.mrf.mxu2  ;;  %v1474_v3 = vpop.f32.mrf.mxu0  ;;  %v1591_v42 = vmul.f32 %v1590_v32, %v3792_v44 }
 0x193   : > { %v1531_v1 = vadd.f32 %v1530_v0, %v1502_v10  ;;  %v1559_v14 = vpop.f32.mrf.mxu3  ;;  %v1475_v12 = vadd.f32 %v1474_v3, %v3770_v60  ;;  %v3826_v22 = vpop.eup %2689  ;;  %v3845_v41 = vmax.f32 %v1580_v13, 1e-08  ;;  %v1601_v27 = vsub.f32 1.5, %v1600_v2 }
 0x194   : > { %v1503_v24 = vpop.f32.mrf.mxu1  ;;  %v1610_v59 = vmul.f32 %v3826_v22, %v3809_v54  ;;  %v1593_v33 = vsel %vm1592_vm0, %v3792_v44, %v1591_v42 }
 0x195   : > { %v1560_v21 = vadd.f32 %v1559_v14, %v1531_v1  ;;  %v1504_v49 = vadd.f32 %v1503_v24, %v1475_v12  ;;  %v1595_v1 = vand.u32 2147483648, %v3792_v44  ;;  %v1602_v14 = vmul.f32 %v3819_v9, %v1601_v27 }
 0x196   : > { %v1611_v39 = vmul.f32 %v3826_v22, %v1610_v59  ;;  %v1778_v24 = vlaneseq  ;;  %v1619_v9 = vand.u32 2147483648, %v3809_v54 }
 0x197   : > { %v1637_v55 = vmul.f32 %v1560_v21, %v1560_v21  ;;  %v1701_v50 = vadd.f32 %v1560_v21, %v3784_v11  ;;  %v1596_v46 = vsel %vm1594_vm1, %v1595_v1, %v1593_v33  ;;  %v1603_v52 = vmul.f32 %v1602_v14, %v3803_v40 }
 0x198   : > { %v1612_v6 = vmul.f32 0.5, %v1611_v39 }
 0x199   : > { %v1641_v60 = vadd.f32 %v1637_v55, %v1633_v48  ;;  %v1709_v56 = vmul.f32 %v1701_v50, %v1701_v50 }
 0x19a   : > { %v1532_v23 = vpop.f32.mrf.mxu2  ;;  %v1477_v31 = vpop.f32.mrf.mxu0  ;;  %v1613_v20 = vsub.f32 1.5, %v1612_v6 }
 0x19b   : > { %v3838_v57 = vmax.f32 %v1641_v60, 1e-08  ;;  %v1713_v61 = vadd.f32 %v1709_v56, %v1705_v45  ;;  %v1533_v30 = vadd.f32 %v1532_v23, %v1504_v49  ;;  %v1561_v11 = vpop.f32.mrf.mxu3  ;;  %v1478_v34 = vadd.f32 %v1477_v31, %v1449_v51 }
 0x19c   : > { %v1506_v43 = vpop.f32.mrf.mxu1  ;;  %v1614_v56 = vmul.f32 %v3826_v22, %v1613_v20  ;;  %v1605_v22 = vsel %vm1604_vm2, %v3803_v40, %v1603_v52 }
 0x19d   : > { %2691 = vrsqrt.f32 %v3838_v57  ;;  %v3847_v58 = vmax.f32 %v1713_v61, 1e-08  ;;  %v1562_v26 = vadd.f32 %v1561_v11, %v1533_v30  ;;  %v1507_v36 = vadd.f32 %v1506_v43, %v1478_v34 }
 0x19e   : > { %v3895_v30 = vshrl.u32 %v1778_v24, 7  ;;  %vm1656_vm5 = vcmp.eq.f32.partialorder %v3838_v57, inf  ;;  %v1615_v34 = vmul.f32 %v1614_v56, %v3809_v54  ;;  %vm1658_vm6 = vcmp.eq.f32.partialorder %v3838_v57, 0.0 }
 0x19f   : > { %2693 = vrsqrt.f32 %v3847_v58  ;;  %v1638_v17 = vmul.f32 %v1562_v26, %v1562_v26  ;;  %v1702_v28 = vadd.f32 %v1562_v26, %v3790_v29  ;;  %vm1728_vm7 = vcmp.eq.f32.partialorder %v3847_v58, inf }
 0x1a0   : > { %2695 = vrsqrt.f32 %v3845_v41  ;;  %v1731_v14 = vand.u32 2147483648, %v3847_v58  ;;  %vm1730_vm8 = vcmp.eq.f32.partialorder %v3847_v58, 0.0 }
 0x1a1   : > { %v1642_v13 = vadd.f32 %v1638_v17, %v1634_v19  ;;  %v1710_v3 = vmul.f32 %v1702_v28, %v1702_v28  ;;  %v1659_v17 = vand.u32 2147483648, %v3838_v57 }
 0x1a2   : > { %v1535_v8 = vpop.f32.mrf.mxu2  ;;  %v1479_v50 = vpop.f32.mrf.mxu0 }
 0x1a3   : > { %v2692_v10 = vpop.eup %2691  ;;  %v1536_v0 = vadd.f32 %v1535_v8, %v1507_v36  ;;  %v1564_v18 = vpop.f32.mrf.mxu3  ;;  %v3878_v29 = vmax.f32 %v1642_v13, 1e-08  ;;  %v1714_v48 = vadd.f32 %v1710_v3, %v1706_v62  ;;  %v1480_v11 = vadd.f32 %v1479_v50, %v1451_v4 }
 0x1a4   : > { %v1650_v7 = vmul.f32 %v2692_v10, %v3838_v57  ;;  %v1508_v19 = vpop.f32.mrf.mxu1 }
 0x1a5   : > { %v1565_v47 = vadd.f32 %v1564_v18, %v1536_v0  ;;  %v2694_v21 = vpop.eup %2693  ;;  %2697 = vrsqrt.f32 %v3878_v29  ;;  %v3891_v60 = vmax.f32 %v1714_v48, 1e-08  ;;  %v1509_v42 = vadd.f32 %v1508_v19, %v1480_v11 }
 0x1a6   : > { %v1651_v12 = vmul.f32 %v2692_v10, %v1650_v7  ;;  %v1722_v55 = vmul.f32 %v2694_v21, %v3847_v58  ;;  %v3885_v45 = vpop.eup %2695  ;;  %vm1668_vm10 = vcmp.eq.f32.partialorder %v3878_v29, inf  ;;  %vm1670_vm11 = vcmp.eq.f32.partialorder %v3878_v29, 0.0 }
 0x1a7   : > { %v1639_v23 = vmul.f32 %v1565_v47, %v1565_v47  ;;  %v1703_v51 = vadd.f32 %v1565_v47, %v3799_v53  ;;  %2699 = vrsqrt.f32 %v3891_v60  ;;  %v1622_v44 = vmul.f32 %v3885_v45, %v3845_v41 }
 0x1a8   : > { %v1652_v59 = vmul.f32 0.5, %v1651_v12  ;;  %v1723_v49 = vmul.f32 %v2694_v21, %v1722_v55  ;;  %v1608_v55 = vsel %vm1606_vm3, %v1607_v15, %v1605_v22  ;;  %vm1740_vm12 = vcmp.eq.f32.partialorder %v3891_v60, inf }
 0x1a9   : > { %v1643_v2 = vadd.f32 %v1639_v23, %v1635_v63  ;;  %v1711_v32 = vmul.f32 %v1703_v51, %v1703_v51  ;;  %v1623_v6 = vmul.f32 %v3885_v45, %v1622_v44  ;;  %vm1742_vm13 = vcmp.eq.f32.partialorder %v3891_v60, 0.0 }
 0x1aa   : > { %v1653_v61 = vsub.f32 1.5, %v1652_v59  ;;  %v1724_v31 = vmul.f32 0.5, %v1723_v49  ;;  %v1537_v62 = vpop.f32.mrf.mxu2 }
 0x1ab   : > { %v2698_v39 = vpop.eup %2697  ;;  %v3910_v26 = vmax.f32 %v1643_v2, 1e-08  ;;  %v1715_v43 = vadd.f32 %v1711_v32, %v3857_v37  ;;  %v1538_v13 = vadd.f32 %v1537_v62, %v1509_v42  ;;  %v1566_v20 = vpop.f32.mrf.mxu3  ;;  %v1624_v23 = vmul.f32 0.5, %v1623_v6 }
 0x1ac   : > { %v1654_v53 = vmul.f32 %v2692_v10, %v1653_v61  ;;  %v1725_v35 = vsub.f32 1.5, %v1724_v31  ;;  %v1662_v27 = vmul.f32 %v2698_v39, %v3878_v29  ;;  %v1671_v2 = vand.u32 2147483648, %v3878_v29 }
 0x1ad   : > { %2701 = vrsqrt.f32 %v3910_v26  ;;  %v2700_v4 = vpop.eup %2699  ;;  %v3921_v10 = vmax.f32 %v1715_v43, 1e-08  ;;  %v1567_v24 = vadd.f32 %v1566_v20, %v1538_v13  ;;  %v1743_v62 = vand.u32 2147483648, %v3891_v60 }
 0x1ae   : > { %v1655_v63 = vmul.f32 %v1654_v53, %v3838_v57  ;;  %v1726_v36 = vmul.f32 %v2694_v21, %v1725_v35  ;;  %v1663_v8 = vmul.f32 %v2698_v39, %v1662_v27  ;;  %v1734_v1 = vmul.f32 %v2700_v4, %v3891_v60 }
 0x1af   : > { %2703 = vrsqrt.f32 %v3921_v10  ;;  %v1784_v21 = vadd.s32 %v3900_v38, %v3895_v30  ;;  %v1640_v56 = vmul.f32 %v1567_v24, %v1567_v24  ;;  %v1704_v49 = vadd.f32 %v1567_v24, %v3812_v5 }
 0x1b0   : > { %v1657_v28 = vsel %vm1656_vm5, %v3838_v57, %v1655_v63  ;;  %v1727_v0 = vmul.f32 %v1726_v36, %v3847_v58  ;;  %v1664_v3 = vmul.f32 0.5, %v1663_v8  ;;  %v1735_v33 = vmul.f32 %v2700_v4, %v1734_v1 }
 0x1b1   : > { %v1660_v37 = vsel %vm1658_vm6, %v1659_v17, %v1657_v28  ;;  %v1780_v57 = vadd.s32 8, %v3895_v30  ;;  %v1644_v44 = vadd.f32 %v1640_v56, %v3861_v25  ;;  %v1712_v31 = vmul.f32 %v1704_v49, %v1704_v49 }
 0x1b2   : > { %v1769_v7 = vadd.f32 %v1660_v37, %v1596_v46  ;;  %v1729_v18 = vsel %vm1728_vm7, %v3847_v58, %v1727_v0  ;;  %v1665_v12 = vsub.f32 1.5, %v1664_v3  ;;  %v1617_v58 = vsel %vm1616_vm4, %v3809_v54, %v1615_v34 }
 0x1b3   : > { %v1732_v47 = vsel %vm1730_vm8, %v1731_v14, %v1729_v18  ;;  %v2702_v48 = vpop.eup %2701  ;;  %v1736_v46 = vmul.f32 0.5, %v1735_v33  ;;  %v1785_v40 = vadd.s32 %v3900_v38, %v1780_v57  ;;  %v1716_v34 = vadd.f32 %v1712_v31, %v3867_v16 }
 0x1b4   : > { %v1773_v50 = vsub.f32 %v1769_v7, %v1732_v47  ;;  %v1666_v52 = vmul.f32 %v2698_v39, %v1665_v12  ;;  %v1674_v59 = vmul.f32 %v2702_v48, %v3910_v26  ;;  %v3953_v39 = vmax.f32 %v1644_v44, 1e-08 }
 0x1b5   : > { %v1737_v51 = vsub.f32 1.5, %v1736_v46  ;;  %v2704_v15 = vpop.eup %2703  ;;  %v1781_v42 = vadd.s32 16, %v3895_v30  ;;  %v3963_v36 = vmax.f32 %v1716_v34, 1e-08  ;;  %vm1788_vm14 = vcmp.lt.s32.totalorder %v1784_v21, 72 }
 0x1b6   : > { %v1667_v61 = vmul.f32 %v1666_v52, %v3878_v29  ;;  %v1675_v11 = vmul.f32 %v2702_v48, %v1674_v59  ;;  %v1746_v5 = vmul.f32 %v2704_v15, %v3921_v10  ;;  %2705 = vrsqrt.f32 %v3953_v39 }
 0x1b7   : > { %v1738_v22 = vmul.f32 %v2700_v4, %v1737_v51  ;;  %v1792_v16 = vmul.f32 %v1773_v50, %v1773_v50  ;;  %v1620_v4 = vsel %vm1618_vm9, %v1619_v9, %v1617_v58  ;;  %v1625_v13 = vsub.f32 1.5, %v1624_v23 }
 0x1b8   : > { %v1669_v53 = vsel %vm1668_vm10, %v3878_v29, %v1667_v61  ;;  %v1676_v32 = vmul.f32 0.5, %v1675_v11  ;;  %v1747_v25 = vmul.f32 %v2704_v15, %v1746_v5  ;;  %vm1789_vm15 = vcmp.lt.s32.totalorder %v1785_v40, 72 }
 0x1b9   : > { %v1672_v35 = vsel %vm1670_vm11, %v1671_v2, %v1669_v53  ;;  %v1739_v19 = vmul.f32 %v1738_v22, %v3891_v60  ;;  %2707 = vrsqrt.f32 %v3963_v36  ;;  %vm1680_vm0 = vcmp.eq.f32.partialorder %v3910_v26, inf }
 0x1ba   : > { %v1770_v63 = vadd.f32 %v1672_v35, %v1608_v55  ;;  %v1677_v27 = vsub.f32 1.5, %v1676_v32  ;;  %v1748_v29 = vmul.f32 0.5, %v1747_v25  ;;  %v1683_v0 = vand.u32 2147483648, %v3910_v26 }
 0x1bb   : > { %v1741_v43 = vsel %vm1740_vm12, %v3891_v60, %v1739_v19  ;;  %v1804_v7 = vsel %vm1788_vm14, %v1792_v16, 0.0  ;;  %vm1682_vm1 = vcmp.eq.f32.partialorder %v3910_v26, 0.0  ;;  %v1786_v9 = vadd.s32 %v3900_v38, %v1781_v42 }
 0x1bc   : > { %v1744_v6 = vsel %vm1742_vm13, %v1743_v62, %v1741_v43  ;;  %v1678_v17 = vmul.f32 %v2702_v48, %v1677_v27  ;;  %v1749_v8 = vsub.f32 1.5, %v1748_v29  ;;  %v2706_v14 = vpop.eup %2705  ;;  %vm1752_vm2 = vcmp.eq.f32.partialorder %v3921_v10, inf }
 0x1bd   : > { %v1774_v28 = vsub.f32 %v1770_v63, %v1744_v6  ;;  %v1686_v57 = vmul.f32 %v2706_v14, %v3953_v39  ;;  %v1755_v47 = vand.u32 2147483648, %v3921_v10  ;;  %v1626_v12 = vmul.f32 %v3885_v45, %v1625_v13 }
 0x1be   : > { %v1679_v60 = vmul.f32 %v1678_v17, %v3910_v26  ;;  %v1750_v1 = vmul.f32 %v2704_v15, %v1749_v8  ;;  %vm1754_vm3 = vcmp.eq.f32.partialorder %v3921_v10, 0.0  ;;  %vm1790_vm4 = vcmp.lt.s32.totalorder %v1786_v9, 72 }
 0x1bf   : > { %v1793_v37 = vmul.f32 %v1774_v28, %v1774_v28  ;;  %v2708_v48 = vpop.eup %2707  ;;  %v1627_v52 = vmul.f32 %v1626_v12, %v3845_v41  ;;  %vm1628_vm5 = vcmp.eq.f32.partialorder %v3845_v41, inf  ;;  %v1631_v11 = vand.u32 2147483648, %v3845_v41 }
 0x1c0   : > { %v1681_v54 = vsel %vm1680_vm0, %v3910_v26, %v1679_v60  ;;  %v1751_v33 = vmul.f32 %v1750_v1, %v3921_v10  ;;  %v1687_v26 = vmul.f32 %v2706_v14, %v1686_v57  ;;  %v1758_v46 = vmul.f32 %v2708_v48, %v3963_v36 }
 0x1c1   : > { %v1805_v3 = vsel %vm1789_vm15, %v1793_v37, 0.0  ;;  %v1684_v18 = vsel %vm1682_vm1, %v1683_v0, %v1681_v54  ;;  %vm1692_vm6 = vcmp.eq.f32.partialorder %v3953_v39, inf  ;;  %v1695_v44 = vand.u32 2147483648, %v3953_v39 }
 0x1c2   : > { %v1808_v20 = vadd.f32 %v1805_v3, %v1804_v7  ;;  %v1771_v21 = vadd.f32 %v1684_v18, %v1620_v4  ;;  %v1753_v24 = vsel %vm1752_vm2, %v3921_v10, %v1751_v33  ;;  %v1688_v50 = vmul.f32 0.5, %v1687_v26 }
 0x1c3   : > { %v1756_v55 = vsel %vm1754_vm3, %v1755_v47, %v1753_v24  ;;  %v1759_v49 = vmul.f32 %v2708_v48, %v1758_v46  ;;  %v1629_v10 = vsel %vm1628_vm5, %v3845_v41, %v1627_v52  ;;  %v1782_v31 = vadd.s32 24, %v3895_v30 }
 0x1c4   : > { %v1775_v58 = vsub.f32 %v1771_v21, %v1756_v55  ;;  %v1689_v56 = vsub.f32 1.5, %v1688_v50  ;;  %vm1630_vm7 = vcmp.eq.f32.partialorder %v3845_v41, 0.0  ;;  %vm1694_vm8 = vcmp.eq.f32.partialorder %v3953_v39, 0.0 }
 0x1c5   : > { %v1760_v45 = vmul.f32 0.5, %v1759_v49  ;;  %v1632_v5 = vsel %vm1630_vm7, %v1631_v11, %v1629_v10  ;;  %vm1764_vm9 = vcmp.eq.f32.partialorder %v3963_v36, inf  ;;  %v1767_v35 = vand.u32 2147483648, %v3963_v36 }
 0x1c6   : > { %v1794_v59 = vmul.f32 %v1775_v58, %v1775_v58  ;;  %v1690_v51 = vmul.f32 %v2706_v14, %v1689_v56  ;;  %v1787_v30 = vadd.s32 %v3900_v38, %v1782_v31  ;;  %vm1766_vm10 = vcmp.eq.f32.partialorder %v3963_v36, 0.0 }
 0x1c7   : > { %v1761_v61 = vsub.f32 1.5, %v1760_v45 }
 0x1c8   : > { %v1806_v23 = vsel %vm1790_vm4, %v1794_v59, 0.0  ;;  %v1691_v15 = vmul.f32 %v1690_v51, %v3953_v39  ;;  %vm1791_vm11 = vcmp.lt.s32.totalorder %v1787_v30, 72 }
 0x1c9   : > { %v1809_v40 = vadd.f32 %v1808_v20, %v1806_v23  ;;  %v1762_v22 = vmul.f32 %v2708_v48, %v1761_v61 }
 0x1ca   : > { %v1693_v2 = vsel %vm1692_vm6, %v3953_v39, %v1691_v15 }
 0x1cb   : > { %v1696_v53 = vsel %vm1694_vm8, %v1695_v44, %v1693_v2  ;;  %v1763_v32 = vmul.f32 %v1762_v22, %v3963_v36 }
 0x1cc   : > { %v1772_v34 = vadd.f32 %v1696_v53, %v1632_v5 }
 0x1cd   : > { %v1765_v41 = vsel %vm1764_vm9, %v3963_v36, %v1763_v32 }
 0x1ce   : > { %v1768_v19 = vsel %vm1766_vm10, %v1767_v35, %v1765_v41 }
 0x1cf   : > { %v1776_v39 = vsub.f32 %v1772_v34, %v1768_v19 }
 0x1d1   : > { %v1795_v25 = vmul.f32 %v1776_v39, %v1776_v39 }
 0x1d3   : > { %v1807_v62 = vsel %vm1791_vm11, %v1795_v25, 0.0 }
 0x1d4   : > { %v1810_v63 = vadd.f32 %v1809_v40, %v1807_v62 }
 0x1d6   : > { %v1811_v27 = vrot.slane %v1810_v63, 4 }
 0x1d8   : > { %v1812_v43 = vadd.f32 %v1811_v27, %v1810_v63 }
 0x1da   : > { %v1813_v29 = vrot.slane %v1812_v43, 2 }
 0x1dc   : > { %v1814_v42 = vadd.f32 %v1813_v29, %v1812_v43 }
 0x1de   : > { %v1815_v16 = vrot.slane %v1814_v42, 1 }
 0x1e0   : > { %v1816_v38 = vadd.f32 %v1815_v16, %v1814_v42 }
 0x1e2   : > { %1817 = vst [vmem:[%s144_s22] sm:$0x1] %v1816_v38 }
 0x1e3 PF: > { %s12_s9 = sadd.s32 1, %s2715_s9  }
 0x1e4   : > { %p9_p5 = scmp.ge.s32.totalorder %s12_s9, 5  }
 0x1e6   :  { %11 = sbr.rel (!%p9_p5) target bundleno = 1 (0x1), region = 58 }

</bundles_post_ra>
